<compile_context>
chip_gen: v6e
topology: v6e:2x2x1
jax: 0.10.0
libtpu: 0.0.40
codegen_flags: <defaults>
</compile_context>

<pallas_src>
import functools

import jax
import jax.numpy as jnp
from jax.experimental import pallas as pl
from jax.experimental.pallas import tpu as pltpu


def _round_up(x, m):
    return ((x + m - 1) // m) * m


# ---------------------------------------------------------------------------
# One GINConv layer:  out = mlp( A @ H_in + (1+eps) * H_in )
# ---------------------------------------------------------------------------
def _gin_conv_kernel(a_ref, hk_ref, hs_ref, wa_ref, ba_ref, wb_ref, bb_ref,
                     out_ref, acc_ref, *, eps):
    k = pl.program_id(1)

    @pl.when(k == 0)
    def _():
        acc_ref[...] = jnp.zeros_like(acc_ref)

    # Partial neighbor aggregation for this column block of A (bf16 MXU, f32 acc).
    acc_ref[...] += jnp.dot(a_ref[...], hk_ref[...],
                            preferred_element_type=jnp.float32)

    @pl.when(k == pl.num_programs(1) - 1)
    def _():
        # Self term (replaces the eye(N) materialization) + 2-layer MLP.
        agg = acc_ref[...] + (1.0 + eps) * hs_ref[...].astype(jnp.float32)
        z = jnp.dot(agg.astype(jnp.bfloat16), wa_ref[...],
                    preferred_element_type=jnp.float32) + ba_ref[...]
        z = jnp.maximum(z, 0.0)                                   # ReLU
        z = jnp.dot(z.astype(jnp.bfloat16), wb_ref[...],
                    preferred_element_type=jnp.float32) + bb_ref[...]
        out_ref[...] = z.astype(out_ref.dtype)


def _gin_conv_layer(a, h, wa, ba, wb, bb, *, eps, tile):
    n = a.shape[0]
    f_in = h.shape[1]
    f_mid = wa.shape[1]
    f_out = wb.shape[1]
    n_row = n // tile
    n_col = n // tile

    flops = 2 * n * n * f_in + 2 * n * f_in * f_mid + 2 * n * f_mid * f_out
    bytes_accessed = (a.size * 2 + 2 * h.size * 2 + wa.size * 2 + wb.size * 2
                      + (ba.size + bb.size) * 4 + n * f_out * 2)

    grid_spec = pltpu.PrefetchScalarGridSpec(
        num_scalar_prefetch=0,
        grid=(n_row, n_col),
        in_specs=[
            pl.BlockSpec((tile, tile), lambda i, k: (i, k)),     # A tile
            pl.BlockSpec((tile, f_in), lambda i, k: (k, 0)),     # H_in column block
            pl.BlockSpec((tile, f_in), lambda i, k: (i, 0)),     # H_in self (row) block
            pl.BlockSpec((f_in, f_mid), lambda i, k: (0, 0)),    # W_a (resident)
            pl.BlockSpec((1, f_mid), lambda i, k: (0, 0)),       # b_a (f32)
            pl.BlockSpec((f_mid, f_out), lambda i, k: (0, 0)),   # W_b (resident)
            pl.BlockSpec((1, f_out), lambda i, k: (0, 0)),       # b_b (f32)
        ],
        out_specs=pl.BlockSpec((tile, f_out), lambda i, k: (i, 0)),
        scratch_shapes=[pltpu.VMEM((tile, f_in), jnp.float32)],  # f32 aggregation acc
    )
    return pl.pallas_call(
        functools.partial(_gin_conv_kernel, eps=eps),
        out_shape=jax.ShapeDtypeStruct((n, f_out), jnp.bfloat16),
        grid_spec=grid_spec,
        compiler_params=pltpu.CompilerParams(
            dimension_semantics=("parallel", "arbitrary"),
            vmem_limit_bytes=32 * 1024 * 1024),
        cost_estimate=pl.CostEstimate(flops=int(flops), transcendentals=0,
                                      bytes_accessed=int(bytes_accessed)),
    )(a, h, h, wa, ba, wb, bb)


# ---------------------------------------------------------------------------
# Global mean pool:  pooled = P @ H2   (reduction over node-row tiles)
# ---------------------------------------------------------------------------
def _mean_pool_kernel(p_ref, h_ref, out_ref):
    @pl.when(pl.program_id(0) == 0)
    def _():
        out_ref[...] = jnp.zeros_like(out_ref)
    out_ref[...] += jnp.dot(p_ref[...], h_ref[...],
                            preferred_element_type=jnp.float32)


def _mean_pool(p, h, *, tile):
    g, n = p.shape
    f = h.shape[1]
    grid_spec = pltpu.PrefetchScalarGridSpec(
        num_scalar_prefetch=0,
        grid=(n // tile,),
        in_specs=[
            pl.BlockSpec((g, tile), lambda i: (0, i)),
            pl.BlockSpec((tile, f), lambda i: (i, 0)),
        ],
        out_specs=pl.BlockSpec((g, f), lambda i: (0, 0)),
    )
    return pl.pallas_call(
        _mean_pool_kernel,
        out_shape=jax.ShapeDtypeStruct((g, f), jnp.float32),
        grid_spec=grid_spec,
        compiler_params=pltpu.CompilerParams(
            dimension_semantics=("arbitrary",),
            vmem_limit_bytes=32 * 1024 * 1024),
    )(p, h)


# ---------------------------------------------------------------------------
# Full forward: plain-JAX glue (densify / pad / bf16 cast) + 3 Pallas calls.
# ---------------------------------------------------------------------------
def gin_forward(x, edge_index, batch, params, num_graphs, *, eps=0.0, tile=128):
    (w1a, b1a, w1b, b1b, w2a, b2a, w2b, b2b, wl, bl) = params
    n, _ = x.shape
    n_pad = _round_up(max(n, tile), tile)
    g_pad = _round_up(max(num_graphs, 8), 8)

    # Dense aggregation matrix (no eye -- self term added in-kernel).
    src, dst = edge_index[0], edge_index[1]
    a = jnp.zeros((n_pad, n_pad), jnp.float32).at[dst, src].add(1.0)

    # Mean-pool matrix P[g, node] = 1/count_g  (zero rows for padded graphs,
    # zero cols for padded nodes, so padding never leaks into the result).
    one_hot = (batch[None, :] == jnp.arange(g_pad, dtype=batch.dtype)[:, None])
    one_hot = one_hot.astype(jnp.float32)
    counts = jnp.maximum(one_hot.sum(axis=1, keepdims=True), 1.0)
    p = jnp.pad(one_hot / counts, ((0, 0), (0, n_pad - n)))

    x_p = jnp.pad(x, ((0, n_pad - n), (0, 0)))

    bf16 = jnp.bfloat16
    a = a.astype(bf16)            # integer edge counts: exact in bf16
    x_p = x_p.astype(bf16)
    p = p.astype(bf16)

    h1 = _gin_conv_layer(a, x_p, w1a.astype(bf16), b1a, w1b.astype(bf16), b1b,
                         eps=eps, tile=tile)
    h2 = _gin_conv_layer(a, h1, w2a.astype(bf16), b2a, w2b.astype(bf16), b2b,
                         eps=eps, tile=tile)
    pooled = _mean_pool(p, h2, tile=tile)[:num_graphs]        # [G, H] f32

    # Final Linear ([G,H]@[H,out]): ~G*H FLOPs -> keep in XLA so the kernels'
    # stores stay lane-dense (no masked (G, 1) writeback).
    return pooled @ wl + bl


# ---------------------------------------------------------------------------
# Parameter init + references
# ---------------------------------------------------------------------------
def init_params(key, in_channels, hidden_dim, out_channels):
    ks = jax.random.split(key, 5)

    def lin(k, fan_in, fan_out):
        bound = 1.0 / jnp.sqrt(fan_in)
        kw, kb = jax.random.split(k)
        w = jax.random.uniform(kw, (fan_in, fan_out), jnp.float32, -bound, bound)
        b = jax.random.uniform(kb, (1, fan_out), jnp.float32, -bound, bound)
        return w, b

    w1a, b1a = lin(ks[0], in_channels, hidden_dim)
    w1b, b1b = lin(ks[1], hidden_dim, hidden_dim)
    w2a, b2a = lin(ks[2], hidden_dim, hidden_dim)
    w2b, b2b = lin(ks[3], hidden_dim, hidden_dim)
    wl, bl = lin(ks[4], hidden_dim, out_channels)
    return (w1a, b1a, w1b, b1b, w2a, b2a, w2b, b2b, wl, bl)


def reference_forward(x, edge_index, batch, params, num_graphs, eps=0.0):
    """Pure-f32 JAX reference mirroring the PyTorch module (defaults)."""
    (w1a, b1a, w1b, b1b, w2a, b2a, w2b, b2b, wl, bl) = params
    src, dst = edge_index[0], edge_index[1]

    def conv(h, wa, ba, wb, bb):
        agg = jnp.zeros_like(h).at[dst].add(h[src]) + (1.0 + eps) * h
        return jnp.maximum(agg @ wa + ba, 0.0) @ wb + bb

    h = conv(x, w1a, b1a, w1b, b1b)
    h = conv(h, w2a, b2a, w2b, b2b)
    one_hot = (batch[None, :] == jnp.arange(num_graphs)[:, None]).astype(jnp.float32)
    counts = jnp.maximum(one_hot.sum(axis=1, keepdims=True), 1.0)
    pooled = (one_hot / counts) @ h
    return pooled @ wl + bl


def _q(v):
    return v.astype(jnp.bfloat16).astype(jnp.float32)


def reference_forward_bf16(x, edge_index, batch, params, num_graphs, eps=0.0):
    """Reference mirroring the kernel's bf16-input / f32-accumulate numerics."""
    (w1a, b1a, w1b, b1b, w2a, b2a, w2b, b2b, wl, bl) = params
    n = x.shape[0]
    src, dst = edge_index[0], edge_index[1]
    a = _q(jnp.zeros((n, n), jnp.float32).at[dst, src].add(1.0))

    def conv(hq, wa, ba, wb, bb):
        agg = a @ hq + (1.0 + eps) * hq
        z = jnp.maximum(_q(agg) @ _q(wa) + ba, 0.0)
        return _q(_q(z) @ _q(wb) + bb)

    h = conv(_q(x), w1a, b1a, w1b, b1b)
    h = conv(h, w2a, b2a, w2b, b2b)
    one_hot = (batch[None, :] == jnp.arange(num_graphs)[:, None]).astype(jnp.float32)
    counts = jnp.maximum(one_hot.sum(axis=1, keepdims=True), 1.0)
    pooled = _q(one_hot / counts) @ h
    return pooled @ wl + bl


if __name__ == "__main__":
    key = jax.random.PRNGKey(0)
    k_x, k_e, k_p = jax.random.split(key, 3)

    # Small but lane-friendly sizes (per the perf review): nodes pad to a 2x2
    # grid of 128-tiles, hidden fills the 128-lane dimension.
    N = 256           # nodes
    E = 1024          # edges
    IN_CH = 16        # in_channels
    HIDDEN = 128      # hidden_dim
    OUT_CH = 1        # out_channels
    G = 4             # graphs in the batch

    x = jax.random.normal(k_x, (N, IN_CH), jnp.float32)
    edge_index = jax.random.randint(k_e, (2, E), 0, N, dtype=jnp.int32)
    batch = jnp.repeat(jnp.arange(G, dtype=jnp.int32), N // G)

    params = init_params(k_p, IN_CH, HIDDEN, OUT_CH)

    fwd = jax.jit(gin_forward, static_argnames=("num_graphs", "eps", "tile"))
    out = fwd(x, edge_index, batch, params, G)
    out = jax.block_until_ready(out)

    ref_bf16 = reference_forward_bf16(x, edge_index, batch, params, G)
    ref_f32 = reference_forward(x, edge_index, batch, params, G)

    assert out.shape == (G, OUT_CH), out.shape
    # Tight: kernel matches the intended bf16-input / f32-accumulate math.
    assert jnp.allclose(out, ref_bf16, atol=1e-2, rtol=1e-2), (out, ref_bf16)
    # Loose: bf16 quantization stays close to the full-f32 module semantics.
    assert jnp.allclose(out, ref_f32, atol=1e-1, rtol=1e-1), (out, ref_f32)

    print("KERNEL_OK")
</pallas_src>

<mosaic_0001>
module attributes {stable_mosaic.version = 11 : i64} {
  func.func private @main(%arg0: i32) attributes {dimension_semantics = [#tpu.dimension_semantics<core_parallel>], iteration_bounds = array<i64: 2>, tpu.core_type = #tpu.core_type<sc_scalar_subcore>, window_params = []} {
    return
  }
}

module attributes {stable_mosaic.version = 11 : i64} {
  func.func private @main(%arg0: i32) attributes {dimension_semantics = [#tpu.dimension_semantics<core_parallel>], iteration_bounds = array<i64: 2>, tpu.core_type = #tpu.core_type<sc_scalar_subcore>, window_params = []} {
    return
  }
}

module attributes {stable_mosaic.version = 11 : i64} {
  func.func @_gin_conv_kernel(%arg0: i32, %arg1: i32, %arg2: memref<128x128xbf16, #tpu.memory_space<vmem>>, %arg3: memref<128x16xbf16, #tpu.memory_space<vmem>>, %arg4: memref<128x16xbf16, #tpu.memory_space<vmem>>, %arg5: memref<16x128xbf16, #tpu.memory_space<vmem>>, %arg6: memref<1x128xf32, #tpu.memory_space<vmem>>, %arg7: memref<128x128xbf16, #tpu.memory_space<vmem>>, %arg8: memref<1x128xf32, #tpu.memory_space<vmem>>, %arg9: memref<128x128xbf16, #tpu.memory_space<vmem>>, %arg10: memref<128x16xf32, #tpu.memory_space<vmem>>) attributes {dimension_semantics = [#tpu.dimension_semantics<parallel>, #tpu.dimension_semantics<arbitrary>], iteration_bounds = array<i64: 2, 2>, scalar_prefetch = 0 : i64, scratch_operands = 1 : i64, tpu.core_type = #tpu.core_type<tc>, window_params = [{transform_indices = @transform_0, window_bounds = array<i64: 128, 128>}, {transform_indices = @transform_1, window_bounds = array<i64: 128, 16>}, {transform_indices = @transform_2, window_bounds = array<i64: 128, 16>}, {pipeline_mode = #tpu.pipeline_mode<synchronous>, transform_indices = @transform_3, window_bounds = array<i64: 16, 128>}, {pipeline_mode = #tpu.pipeline_mode<synchronous>, transform_indices = @transform_4, window_bounds = array<i64: 1, 128>}, {pipeline_mode = #tpu.pipeline_mode<synchronous>, transform_indices = @transform_5, window_bounds = array<i64: 128, 128>}, {pipeline_mode = #tpu.pipeline_mode<synchronous>, transform_indices = @transform_6, window_bounds = array<i64: 1, 128>}, {transform_indices = @transform_7, window_bounds = array<i64: 128, 128>}]} {
    %c0_i32 = arith.constant 0 : i32
    %0 = arith.cmpi eq, %arg1, %c0_i32 : i32
    %1 = arith.extui %0 : i1 to i32
    %c0_i32_0 = arith.constant 0 : i32
    %2 = arith.cmpi ne, %1, %c0_i32_0 : i32
    scf.if %2 {
      %cst_9 = arith.constant 0.000000e+00 : f32
      %12 = vector.broadcast %cst_9 : f32 to vector<128x16xf32>
      %c0_10 = arith.constant 0 : index
      %c0_11 = arith.constant 0 : index
      %13 = vector.load %arg10[%c0_10, %c0_11] : memref<128x16xf32, #tpu.memory_space<vmem>>, vector<128x16xf32>
      tpu.vector_store %arg10[%c0_10, %c0_11], %12 {strides = array<i32>} : memref<128x16xf32, #tpu.memory_space<vmem>>, vector<128x16xf32>,
    } else {
    }
    %c0 = arith.constant 0 : index
    %c0_1 = arith.constant 0 : index
    %3 = vector.load %arg10[%c0, %c0_1] : memref<128x16xf32, #tpu.memory_space<vmem>>, vector<128x16xf32>
    %c0_2 = arith.constant 0 : index
    %c0_3 = arith.constant 0 : index
    %4 = vector.load %arg2[%c0_2, %c0_3] : memref<128x128xbf16, #tpu.memory_space<vmem>>, vector<128x128xbf16>
    %c0_4 = arith.constant 0 : index
    %c0_5 = arith.constant 0 : index
    %5 = vector.load %arg3[%c0_4, %c0_5] : memref<128x16xbf16, #tpu.memory_space<vmem>>, vector<128x16xbf16>
    %cst = arith.constant dense<0.000000e+00> : vector<128x16xf32>
    %6 = tpu.matmul %4, %5, %cst {dimension_numbers = #tpu.dot_dimension_numbers<[1], [0], [0], [1], [0, 0, 1, 1], [], []>} : vector<128x128xbf16>, vector<128x16xbf16>, vector<128x16xf32> -> vector<128x16xf32>
    %7 = arith.addf %3, %6 : vector<128x16xf32>
    %c0_6 = arith.constant 0 : index
    %c0_7 = arith.constant 0 : index
    %8 = vector.load %arg10[%c0_6, %c0_7] : memref<128x16xf32, #tpu.memory_space<vmem>>, vector<128x16xf32>
    tpu.vector_store %arg10[%c0_6, %c0_7], %7 {strides = array<i32>} : memref<128x16xf32, #tpu.memory_space<vmem>>, vector<128x16xf32>,
    %c1_i32 = arith.constant 1 : i32
    %9 = arith.cmpi eq, %arg1, %c1_i32 : i32
    %10 = arith.extui %9 : i1 to i32
    %c0_i32_8 = arith.constant 0 : i32
    %11 = arith.cmpi ne, %10, %c0_i32_8 : i32
    scf.if %11 {
      %c0_9 = arith.constant 0 : index
      %c0_10 = arith.constant 0 : index
      %12 = vector.load %arg10[%c0_9, %c0_10] : memref<128x16xf32, #tpu.memory_space<vmem>>, vector<128x16xf32>
      %c0_11 = arith.constant 0 : index
      %c0_12 = arith.constant 0 : index
      %13 = vector.load %arg4[%c0_11, %c0_12] : memref<128x16xbf16, #tpu.memory_space<vmem>>, vector<128x16xbf16>
      %14 = arith.extf %13 : vector<128x16xbf16> to vector<128x16xf32>
      %cst_13 = arith.constant 1.000000e+00 : f32
      %15 = vector.broadcast %cst_13 : f32 to vector<128x16xf32>
      %16 = arith.mulf %15, %14 : vector<128x16xf32>
      %17 = arith.addf %12, %16 : vector<128x16xf32>
      %18 = arith.truncf %17 : vector<128x16xf32> to vector<128x16xbf16>
      %c0_14 = arith.constant 0 : index
      %c0_15 = arith.constant 0 : index
      %19 = vector.load %arg5[%c0_14, %c0_15] : memref<16x128xbf16, #tpu.memory_space<vmem>>, vector<16x128xbf16>
      %cst_16 = arith.constant dense<0.000000e+00> : vector<128x128xf32>
      %20 = tpu.matmul %18, %19, %cst_16 {dimension_numbers = #tpu.dot_dimension_numbers<[1], [0], [0], [1], [0, 0, 1, 1], [], []>} : vector<128x16xbf16>, vector<16x128xbf16>, vector<128x128xf32> -> vector<128x128xf32>
      %c0_17 = arith.constant 0 : index
      %c0_18 = arith.constant 0 : index
      %21 = vector.load %arg6[%c0_17, %c0_18] : memref<1x128xf32, #tpu.memory_space<vmem>>, vector<1x128xf32>
      %22 = vector.broadcast %21 : vector<1x128xf32> to vector<128x128xf32>
      %23 = arith.addf %20, %22 : vector<128x128xf32>
      %cst_19 = arith.constant 0.000000e+00 : f32
      %24 = vector.broadcast %cst_19 : f32 to vector<128x128xf32>
      %25 = arith.maximumf %23, %24 : vector<128x128xf32>
      %26 = arith.truncf %25 : vector<128x128xf32> to vector<128x128xbf16>
      %c0_20 = arith.constant 0 : index
      %c0_21 = arith.constant 0 : index
      %27 = vector.load %arg7[%c0_20, %c0_21] : memref<128x128xbf16, #tpu.memory_space<vmem>>, vector<128x128xbf16>
      %cst_22 = arith.constant dense<0.000000e+00> : vector<128x128xf32>
      %28 = tpu.matmul %26, %27, %cst_22 {dimension_numbers = #tpu.dot_dimension_numbers<[1], [0], [0], [1], [0, 0, 1, 1], [], []>} : vector<128x128xbf16>, vector<128x128xbf16>, vector<128x128xf32> -> vector<128x128xf32>
      %c0_23 = arith.constant 0 : index
      %c0_24 = arith.constant 0 : index
      %29 = vector.load %arg8[%c0_23, %c0_24] : memref<1x128xf32, #tpu.memory_space<vmem>>, vector<1x128xf32>
      %30 = vector.broadcast %29 : vector<1x128xf32> to vector<128x128xf32>
      %31 = arith.addf %28, %30 : vector<128x128xf32>
      %32 = arith.truncf %31 : vector<128x128xf32> to vector<128x128xbf16>
      %c0_25 = arith.constant 0 : index
      %c0_26 = arith.constant 0 : index
      %33 = vector.load %arg9[%c0_25, %c0_26] : memref<128x128xbf16, #tpu.memory_space<vmem>>, vector<128x128xbf16>
      tpu.vector_store %arg9[%c0_25, %c0_26], %32 {strides = array<i32>} : memref<128x128xbf16, #tpu.memory_space<vmem>>, vector<128x128xbf16>,
    } else {
    }
    return
  }
  func.func @transform_0(%arg0: i32, %arg1: i32) -> (i32, i32) {
    %c0_i32 = arith.constant 0 : i32
    return %arg0, %arg1 : i32, i32
  }
  func.func @transform_1(%arg0: i32, %arg1: i32) -> (i32, i32) {
    %c0_i32 = arith.constant 0 : i32
    %c0_i32_0 = arith.constant 0 : i32
    return %arg1, %c0_i32 : i32, i32
  }
  func.func @transform_2(%arg0: i32, %arg1: i32) -> (i32, i32) {
    %c0_i32 = arith.constant 0 : i32
    %c0_i32_0 = arith.constant 0 : i32
    return %arg0, %c0_i32 : i32, i32
  }
  func.func @transform_3(%arg0: i32, %arg1: i32) -> (i32, i32) {
    %c0_i32 = arith.constant 0 : i32
    %c0_i32_0 = arith.constant 0 : i32
    %c0_i32_1 = arith.constant 0 : i32
    return %c0_i32, %c0_i32_0 : i32, i32
  }
  func.func @transform_4(%arg0: i32, %arg1: i32) -> (i32, i32) {
    %c0_i32 = arith.constant 0 : i32
    %c0_i32_0 = arith.constant 0 : i32
    %c0_i32_1 = arith.constant 0 : i32
    return %c0_i32, %c0_i32_0 : i32, i32
  }
  func.func @transform_5(%arg0: i32, %arg1: i32) -> (i32, i32) {
    %c0_i32 = arith.constant 0 : i32
    %c0_i32_0 = arith.constant 0 : i32
    %c0_i32_1 = arith.constant 0 : i32
    return %c0_i32, %c0_i32_0 : i32, i32
  }
  func.func @transform_6(%arg0: i32, %arg1: i32) -> (i32, i32) {
    %c0_i32 = arith.constant 0 : i32
    %c0_i32_0 = arith.constant 0 : i32
    %c0_i32_1 = arith.constant 0 : i32
    return %c0_i32, %c0_i32_0 : i32, i32
  }
  func.func @transform_7(%arg0: i32, %arg1: i32) -> (i32, i32) {
    %c0_i32 = arith.constant 0 : i32
    %c0_i32_0 = arith.constant 0 : i32
    return %arg0, %c0_i32 : i32, i32
  }
}

module attributes {stable_mosaic.version = 11 : i64} {
  func.func @_gin_conv_kernel(%arg0: i32, %arg1: i32, %arg2: memref<128x128xbf16, #tpu.memory_space<vmem>>, %arg3: memref<128x128xbf16, #tpu.memory_space<vmem>>, %arg4: memref<128x128xbf16, #tpu.memory_space<vmem>>, %arg5: memref<128x128xbf16, #tpu.memory_space<vmem>>, %arg6: memref<1x128xf32, #tpu.memory_space<vmem>>, %arg7: memref<128x128xbf16, #tpu.memory_space<vmem>>, %arg8: memref<1x128xf32, #tpu.memory_space<vmem>>, %arg9: memref<128x128xbf16, #tpu.memory_space<vmem>>, %arg10: memref<128x128xf32, #tpu.memory_space<vmem>>) attributes {dimension_semantics = [#tpu.dimension_semantics<parallel>, #tpu.dimension_semantics<arbitrary>], iteration_bounds = array<i64: 2, 2>, scalar_prefetch = 0 : i64, scratch_operands = 1 : i64, tpu.core_type = #tpu.core_type<tc>, window_params = [{transform_indices = @transform_0, window_bounds = array<i64: 128, 128>}, {transform_indices = @transform_1, window_bounds = array<i64: 128, 128>}, {transform_indices = @transform_2, window_bounds = array<i64: 128, 128>}, {pipeline_mode = #tpu.pipeline_mode<synchronous>, transform_indices = @transform_3, window_bounds = array<i64: 128, 128>}, {pipeline_mode = #tpu.pipeline_mode<synchronous>, transform_indices = @transform_4, window_bounds = array<i64: 1, 128>}, {pipeline_mode = #tpu.pipeline_mode<synchronous>, transform_indices = @transform_5, window_bounds = array<i64: 128, 128>}, {pipeline_mode = #tpu.pipeline_mode<synchronous>, transform_indices = @transform_6, window_bounds = array<i64: 1, 128>}, {transform_indices = @transform_7, window_bounds = array<i64: 128, 128>}]} {
    %c0_i32 = arith.constant 0 : i32
    %0 = arith.cmpi eq, %arg1, %c0_i32 : i32
    %1 = arith.extui %0 : i1 to i32
    %c0_i32_0 = arith.constant 0 : i32
    %2 = arith.cmpi ne, %1, %c0_i32_0 : i32
    scf.if %2 {
      %cst_9 = arith.constant 0.000000e+00 : f32
      %12 = vector.broadcast %cst_9 : f32 to vector<128x128xf32>
      %c0_10 = arith.constant 0 : index
      %c0_11 = arith.constant 0 : index
      %13 = vector.load %arg10[%c0_10, %c0_11] : memref<128x128xf32, #tpu.memory_space<vmem>>, vector<128x128xf32>
      tpu.vector_store %arg10[%c0_10, %c0_11], %12 {strides = array<i32>} : memref<128x128xf32, #tpu.memory_space<vmem>>, vector<128x128xf32>,
    } else {
    }
    %c0 = arith.constant 0 : index
    %c0_1 = arith.constant 0 : index
    %3 = vector.load %arg10[%c0, %c0_1] : memref<128x128xf32, #tpu.memory_space<vmem>>, vector<128x128xf32>
    %c0_2 = arith.constant 0 : index
    %c0_3 = arith.constant 0 : index
    %4 = vector.load %arg2[%c0_2, %c0_3] : memref<128x128xbf16, #tpu.memory_space<vmem>>, vector<128x128xbf16>
    %c0_4 = arith.constant 0 : index
    %c0_5 = arith.constant 0 : index
    %5 = vector.load %arg3[%c0_4, %c0_5] : memref<128x128xbf16, #tpu.memory_space<vmem>>, vector<128x128xbf16>
    %cst = arith.constant dense<0.000000e+00> : vector<128x128xf32>
    %6 = tpu.matmul %4, %5, %cst {dimension_numbers = #tpu.dot_dimension_numbers<[1], [0], [0], [1], [0, 0, 1, 1], [], []>} : vector<128x128xbf16>, vector<128x128xbf16>, vector<128x128xf32> -> vector<128x128xf32>
    %7 = arith.addf %3, %6 : vector<128x128xf32>
    %c0_6 = arith.constant 0 : index
    %c0_7 = arith.constant 0 : index
    %8 = vector.load %arg10[%c0_6, %c0_7] : memref<128x128xf32, #tpu.memory_space<vmem>>, vector<128x128xf32>
    tpu.vector_store %arg10[%c0_6, %c0_7], %7 {strides = array<i32>} : memref<128x128xf32, #tpu.memory_space<vmem>>, vector<128x128xf32>,
    %c1_i32 = arith.constant 1 : i32
    %9 = arith.cmpi eq, %arg1, %c1_i32 : i32
    %10 = arith.extui %9 : i1 to i32
    %c0_i32_8 = arith.constant 0 : i32
    %11 = arith.cmpi ne, %10, %c0_i32_8 : i32
    scf.if %11 {
      %c0_9 = arith.constant 0 : index
      %c0_10 = arith.constant 0 : index
      %12 = vector.load %arg10[%c0_9, %c0_10] : memref<128x128xf32, #tpu.memory_space<vmem>>, vector<128x128xf32>
      %c0_11 = arith.constant 0 : index
      %c0_12 = arith.constant 0 : index
      %13 = vector.load %arg4[%c0_11, %c0_12] : memref<128x128xbf16, #tpu.memory_space<vmem>>, vector<128x128xbf16>
      %14 = arith.extf %13 : vector<128x128xbf16> to vector<128x128xf32>
      %cst_13 = arith.constant 1.000000e+00 : f32
      %15 = vector.broadcast %cst_13 : f32 to vector<128x128xf32>
      %16 = arith.mulf %15, %14 : vector<128x128xf32>
      %17 = arith.addf %12, %16 : vector<128x128xf32>
      %18 = arith.truncf %17 : vector<128x128xf32> to vector<128x128xbf16>
      %c0_14 = arith.constant 0 : index
      %c0_15 = arith.constant 0 : index
      %19 = vector.load %arg5[%c0_14, %c0_15] : memref<128x128xbf16, #tpu.memory_space<vmem>>, vector<128x128xbf16>
      %cst_16 = arith.constant dense<0.000000e+00> : vector<128x128xf32>
      %20 = tpu.matmul %18, %19, %cst_16 {dimension_numbers = #tpu.dot_dimension_numbers<[1], [0], [0], [1], [0, 0, 1, 1], [], []>} : vector<128x128xbf16>, vector<128x128xbf16>, vector<128x128xf32> -> vector<128x128xf32>
      %c0_17 = arith.constant 0 : index
      %c0_18 = arith.constant 0 : index
      %21 = vector.load %arg6[%c0_17, %c0_18] : memref<1x128xf32, #tpu.memory_space<vmem>>, vector<1x128xf32>
      %22 = vector.broadcast %21 : vector<1x128xf32> to vector<128x128xf32>
      %23 = arith.addf %20, %22 : vector<128x128xf32>
      %cst_19 = arith.constant 0.000000e+00 : f32
      %24 = vector.broadcast %cst_19 : f32 to vector<128x128xf32>
      %25 = arith.maximumf %23, %24 : vector<128x128xf32>
      %26 = arith.truncf %25 : vector<128x128xf32> to vector<128x128xbf16>
      %c0_20 = arith.constant 0 : index
      %c0_21 = arith.constant 0 : index
      %27 = vector.load %arg7[%c0_20, %c0_21] : memref<128x128xbf16, #tpu.memory_space<vmem>>, vector<128x128xbf16>
      %cst_22 = arith.constant dense<0.000000e+00> : vector<128x128xf32>
      %28 = tpu.matmul %26, %27, %cst_22 {dimension_numbers = #tpu.dot_dimension_numbers<[1], [0], [0], [1], [0, 0, 1, 1], [], []>} : vector<128x128xbf16>, vector<128x128xbf16>, vector<128x128xf32> -> vector<128x128xf32>
      %c0_23 = arith.constant 0 : index
      %c0_24 = arith.constant 0 : index
      %29 = vector.load %arg8[%c0_23, %c0_24] : memref<1x128xf32, #tpu.memory_space<vmem>>, vector<1x128xf32>
      %30 = vector.broadcast %29 : vector<1x128xf32> to vector<128x128xf32>
      %31 = arith.addf %28, %30 : vector<128x128xf32>
      %32 = arith.truncf %31 : vector<128x128xf32> to vector<128x128xbf16>
      %c0_25 = arith.constant 0 : index
      %c0_26 = arith.constant 0 : index
      %33 = vector.load %arg9[%c0_25, %c0_26] : memref<128x128xbf16, #tpu.memory_space<vmem>>, vector<128x128xbf16>
      tpu.vector_store %arg9[%c0_25, %c0_26], %32 {strides = array<i32>} : memref<128x128xbf16, #tpu.memory_space<vmem>>, vector<128x128xbf16>,
    } else {
    }
    return
  }
  func.func @transform_0(%arg0: i32, %arg1: i32) -> (i32, i32) {
    %c0_i32 = arith.constant 0 : i32
    return %arg0, %arg1 : i32, i32
  }
  func.func @transform_1(%arg0: i32, %arg1: i32) -> (i32, i32) {
    %c0_i32 = arith.constant 0 : i32
    %c0_i32_0 = arith.constant 0 : i32
    return %arg1, %c0_i32 : i32, i32
  }
  func.func @transform_2(%arg0: i32, %arg1: i32) -> (i32, i32) {
    %c0_i32 = arith.constant 0 : i32
    %c0_i32_0 = arith.constant 0 : i32
    return %arg0, %c0_i32 : i32, i32
  }
  func.func @transform_3(%arg0: i32, %arg1: i32) -> (i32, i32) {
    %c0_i32 = arith.constant 0 : i32
    %c0_i32_0 = arith.constant 0 : i32
    %c0_i32_1 = arith.constant 0 : i32
    return %c0_i32, %c0_i32_0 : i32, i32
  }
  func.func @transform_4(%arg0: i32, %arg1: i32) -> (i32, i32) {
    %c0_i32 = arith.constant 0 : i32
    %c0_i32_0 = arith.constant 0 : i32
    %c0_i32_1 = arith.constant 0 : i32
    return %c0_i32, %c0_i32_0 : i32, i32
  }
  func.func @transform_5(%arg0: i32, %arg1: i32) -> (i32, i32) {
    %c0_i32 = arith.constant 0 : i32
    %c0_i32_0 = arith.constant 0 : i32
    %c0_i32_1 = arith.constant 0 : i32
    return %c0_i32, %c0_i32_0 : i32, i32
  }
  func.func @transform_6(%arg0: i32, %arg1: i32) -> (i32, i32) {
    %c0_i32 = arith.constant 0 : i32
    %c0_i32_0 = arith.constant 0 : i32
    %c0_i32_1 = arith.constant 0 : i32
    return %c0_i32, %c0_i32_0 : i32, i32
  }
  func.func @transform_7(%arg0: i32, %arg1: i32) -> (i32, i32) {
    %c0_i32 = arith.constant 0 : i32
    %c0_i32_0 = arith.constant 0 : i32
    return %arg0, %c0_i32 : i32, i32
  }
}

module attributes {stable_mosaic.version = 11 : i64} {
  func.func @_mean_pool_kernel(%arg0: i32, %arg1: memref<8x128xbf16, #tpu.memory_space<vmem>>, %arg2: memref<128x128xbf16, #tpu.memory_space<vmem>>, %arg3: memref<8x128xf32, #tpu.memory_space<vmem>>) attributes {dimension_semantics = [#tpu.dimension_semantics<arbitrary>], iteration_bounds = array<i64: 2>, scalar_prefetch = 0 : i64, scratch_operands = 0 : i64, tpu.core_type = #tpu.core_type<tc>, window_params = [{transform_indices = @transform_0, window_bounds = array<i64: 8, 128>}, {transform_indices = @transform_1, window_bounds = array<i64: 128, 128>}, {pipeline_mode = #tpu.pipeline_mode<synchronous>, transform_indices = @transform_2, window_bounds = array<i64: 8, 128>}]} {
    %c0_i32 = arith.constant 0 : i32
    %0 = arith.cmpi eq, %arg0, %c0_i32 : i32
    %1 = arith.extui %0 : i1 to i32
    %c0_i32_0 = arith.constant 0 : i32
    %2 = arith.cmpi ne, %1, %c0_i32_0 : i32
    scf.if %2 {
      %cst_8 = arith.constant 0.000000e+00 : f32
      %9 = vector.broadcast %cst_8 : f32 to vector<8x128xf32>
      %c0_9 = arith.constant 0 : index
      %c0_10 = arith.constant 0 : index
      %10 = vector.load %arg3[%c0_9, %c0_10] : memref<8x128xf32, #tpu.memory_space<vmem>>, vector<8x128xf32>
      tpu.vector_store %arg3[%c0_9, %c0_10], %9 {strides = array<i32>} : memref<8x128xf32, #tpu.memory_space<vmem>>, vector<8x128xf32>,
    } else {
    }
    %c0 = arith.constant 0 : index
    %c0_1 = arith.constant 0 : index
    %3 = vector.load %arg3[%c0, %c0_1] : memref<8x128xf32, #tpu.memory_space<vmem>>, vector<8x128xf32>
    %c0_2 = arith.constant 0 : index
    %c0_3 = arith.constant 0 : index
    %4 = vector.load %arg1[%c0_2, %c0_3] : memref<8x128xbf16, #tpu.memory_space<vmem>>, vector<8x128xbf16>
    %c0_4 = arith.constant 0 : index
    %c0_5 = arith.constant 0 : index
    %5 = vector.load %arg2[%c0_4, %c0_5] : memref<128x128xbf16, #tpu.memory_space<vmem>>, vector<128x128xbf16>
    %cst = arith.constant dense<0.000000e+00> : vector<8x128xf32>
    %6 = tpu.matmul %4, %5, %cst {dimension_numbers = #tpu.dot_dimension_numbers<[1], [0], [0], [1], [0, 0, 1, 1], [], []>} : vector<8x128xbf16>, vector<128x128xbf16>, vector<8x128xf32> -> vector<8x128xf32>
    %7 = arith.addf %3, %6 : vector<8x128xf32>
    %c0_6 = arith.constant 0 : index
    %c0_7 = arith.constant 0 : index
    %8 = vector.load %arg3[%c0_6, %c0_7] : memref<8x128xf32, #tpu.memory_space<vmem>>, vector<8x128xf32>
    tpu.vector_store %arg3[%c0_6, %c0_7], %7 {strides = array<i32>} : memref<8x128xf32, #tpu.memory_space<vmem>>, vector<8x128xf32>,
    return
  }
  func.func @transform_0(%arg0: i32) -> (i32, i32) {
    %c0_i32 = arith.constant 0 : i32
    %c0_i32_0 = arith.constant 0 : i32
    return %c0_i32, %arg0 : i32, i32
  }
  func.func @transform_1(%arg0: i32) -> (i32, i32) {
    %c0_i32 = arith.constant 0 : i32
    %c0_i32_0 = arith.constant 0 : i32
    return %arg0, %c0_i32 : i32, i32
  }
  func.func @transform_2(%arg0: i32) -> (i32, i32) {
    %c0_i32 = arith.constant 0 : i32
    %c0_i32_0 = arith.constant 0 : i32
    %c0_i32_1 = arith.constant 0 : i32
    return %c0_i32, %c0_i32_0 : i32, i32
  }
}

</mosaic_0001>

<bundles_post_ra>
// kernel: gin_forward.5
= control target key start
LH: loop header
LB: loop body
LE: loop exit
PB: predicated region body
PF: predicated region fallthrough
CT: control target
= control target key end

     0   :  { %s394_s9 = smov 0   ;;  %s423_s0 = inlined_call_operand.vmem [shape: bf16[8,256], index: 0, kind: input, shape index: {}]   ;;  %s424_s1 = inlined_call_operand.vmem [shape: bf16[256,128], index: 1, kind: input, shape index: {}]   ;;  %s425_s2 = inlined_call_operand.vmem [shape: f32[8,128], index: 2, kind: output, shape index: {}]  }
   0x1 LB: > { %s302_s10 = sadd.s32 4294967295, %s374_s9   ;;  %p305_p0 = scmp.ge.s32.totalorder %s374_s9, 1  ;;  %s374_s9 = sphi %s394_s9, %s12_s9  }
   0x2   : > { %p117_p1 = scmp.lt.s32.totalorder %s374_s9, 3 }
   0x4   : > { %p118_p2 = pnand %p305_p0, %p117_p1 }
   0x5   : > { %p138_p3 = scmp.lt.s32.totalorder (!%p118_p2), %s302_s10, 1  ;;  %s307_s11 = sshll.u32 (!%p118_p2), %s302_s10, 4 }
   0x6   : > { %121 = sbr.rel (%p118_p2) target bundleno = 251 (0xfb), region = 28  ;;  %p143_p4 = scmp.lt.s32.totalorder (!%p118_p2), %s307_s11, 31 }
   0x7   : > { %p309_p5 = scmp.ne.s32.totalorder (!%p118_p2), %s302_s10, 0 }
   0xb   : > { %s139_s12 = scalar_select %p138_p3, %s302_s10, 1 }
   0xc   : > { %s427_s11 = smov (!%p143_p4, %s307_s11), 31  ;;  %152 = sbr.rel (%p309_p5) target bundleno = 19 (0x13), region = 32 }
   0xd   : > { %s306_s13 = sshll.u32 %s139_s12, 2  ;;  %s308_s17 = sshll.u32 %s427_s11, 2 }
   0xe   : > { %s405_s16 = scalar_lea.vmem %s423_s0, %s306_s13  ;;  %s146_s20 = scalar_lea.vmem %s424_s1, %s308_s17 }
  0x11   : > { %v376_v0 = vmov 0.0  }
  0x12   : > { %153 = vst [vmem:[%s425_s2] sm:$0xff] %v376_v0 }
  0x13 PF: > { %v360_v1 = vld [vmem:[%s146_s20 + $0x38] sm:$0xff]   ;;  %v377_v2 = vmov 0.0   ;;  %v361_v3 = vld [vmem:[%s146_s20 + $0x30] sm:$0xff]   ;;  %vm378_vm0 = vmmov 0   ;;  %v362_v4 = vld [vmem:[%s146_s20 + $0x28] sm:$0xff]  }
  0x14   : > { %329 = vmatprep.subr.bf16.mxu0 %v377_v2  ;;  %345 = vmatprep.mubr.msk.bf16.mxu0 %vm378_vm0, %v377_v2  ;;  %v363_v5 = vld [vmem:[%s146_s20 + $0x20] sm:$0xff]   ;;  %v364_v6 = vld [vmem:[%s146_s20 + $0x18] sm:$0xff]   ;;  %v365_v7 = vld [vmem:[%s146_s20 + $0x10] sm:$0xff]  }
  0x15   : > { %330 = vmatpush3.bf16.msra.mxu0 %v360_v1  ;;  %v366_v8 = vld [vmem:[%s146_s20 + $0x8] sm:$0xff]   ;;  %v367_v9 = vld [vmem:[%s146_s20] sm:$0xff]  }
  0x16   : > { %331 = vmatprep.subr.bf16.mxu0 %v377_v2  ;;  %v155_v10 = vld [vmem:[%s405_s16] sm:$0xf] }
  0x19   : > { %332 = vmatpush3.bf16.msra.mxu0 %v361_v3  ;;  %v154_v11 = vld [vmem:[%s425_s2] sm:$0xff] }
  0x1a   : > { %333 = vmatprep.subr.bf16.mxu0 %v377_v2 }
  0x1d   : > { %334 = vmatpush3.bf16.msra.mxu0 %v362_v4 }
  0x1e   : > { %335 = vmatprep.subr.bf16.mxu0 %v377_v2 }
  0x21   : > { %336 = vmatpush3.bf16.msra.mxu0 %v363_v5 }
  0x22   : > { %337 = vmatprep.subr.bf16.mxu0 %v377_v2 }
  0x25   : > { %338 = vmatpush3.bf16.msra.mxu0 %v364_v6 }
  0x26   : > { %339 = vmatprep.subr.bf16.mxu0 %v377_v2 }
  0x29   : > { %340 = vmatpush3.bf16.msra.mxu0 %v365_v7 }
  0x2a   : > { %341 = vmatprep.subr.bf16.mxu0 %v377_v2 }
  0x2d   : > { %342 = vmatpush3.bf16.msra.mxu0 %v366_v8 }
  0x2e   : > { %343 = vmatprep.subr.bf16.mxu0 %v377_v2 }
  0x31   : > { %344 = vmatpush3.bf16.msra.mxu0 %v367_v9 }
  0x34   : > { %346 = vmatmul.mubr.bf16.vlgmr.msra.gmra.mxu0 %v155_v10 }
  0xf4   : > { %v254_v12 = vpop.f32.mrf.mxu0 }
  0xf5   : > { %v260_v13 = vadd.f32 %v254_v12, %v154_v11 }
  0xf6   : > { %v347_v14 = vpop.f32.mrf.mxu0 }
  0xf7   : > { %261 = vst [vmem:[%s425_s2] sm:$0xff] %v260_v13 }
  0xf8   : > { %v257_v15 = vpop.f32.mrf.mxu0 }
  0xfa   : > { %v348_v16 = vpop.f32.mrf.mxu0 }
  0xfb PF: > { %s12_s9 = sadd.s32 1, %s374_s9  }
  0xfc   : > { %p9_p6 = scmp.ge.s32.totalorder %s12_s9, 4  }
  0xfe   :  { %11 = sbr.rel (!%p9_p6) target bundleno = 1 (0x1), region = 61 }

// kernel: gin_forward.3
= control target key start
LH: loop header
LB: loop body
LE: loop exit
PB: predicated region body
PF: predicated region fallthrough
CT: control target
= control target key end

     0   :  { %s1833_s24 = smov 0   ;;  %s1835_s25 = smov 0   ;;  %s2061_s0 = inlined_call_operand.vmem [shape: bf16[256,256], index: 0, kind: input, shape index: {}]   ;;  %s2062_s1 = inlined_call_operand.vmem [shape: bf16[256,16], index: 1, kind: input, shape index: {}, may-alias: {1,2}]   ;;  %s2063_s2 = inlined_call_operand.vmem [shape: bf16[256,16], index: 2, kind: input, shape index: {}, may-alias: {1,2}]   ;;  %s2064_s3 = inlined_call_operand.vmem [shape: bf16[16,128], index: 3, kind: input, shape index: {}]   ;;  %s2065_s4 = inlined_call_operand.vmem [shape: f32[1,128], index: 4, kind: input, shape index: {}]   ;;  %s2066_s5 = inlined_call_operand.vmem [shape: bf16[128,128], index: 5, kind: input, shape index: {}]   ;;  %s2067_s6 = inlined_call_operand.vmem [shape: f32[1,128], index: 6, kind: input, shape index: {}]   ;;  %s2068_s7 = inlined_call_operand.vmem [shape: bf16[256,128], index: 7, kind: output, shape index: {}]  }
   0x1   :  { %s1837_s26 = smov 0   ;;  %s1839_s27 = smov 0  }
   0x2   :  { %s1841_s28 = smov 0   ;;  %s1843_s29 = smov 0  }
   0x3   :  { %s1845_s30 = smov 0  }
   0x4 LB: > { %s26_s8 = sadd.s32 1, %s1782_s28  ;;  %s29_s9 = sadd.s32 1, %s1786_s29  ;;  %s1790_s30 = sphi %s1845_s30, %s17_s30   ;;  %s1786_s29 = sphi %s1843_s29, %s2074_s29   ;;  %s1782_s28 = sphi %s1841_s28, %s2073_s28   ;;  %s1778_s27 = sphi %s1839_s27, %s2072_s27   ;;  %s1774_s26 = sphi %s1837_s26, %s2071_s26   ;;  %s1770_s25 = sphi %s1835_s25, %s2070_s25   ;;  %s1766_s24 = sphi %s1833_s24, %s2069_s24  }
   0x5   : > { %p27_p0 = scmp.ge.s32.totalorder %s26_s8, 2  ;;  %p45_p1 = scmp.ne.s32.totalorder %s1770_s25, %s1766_s24 }
   0x6   : > { %p46_p2 = scmp.eq.s32.totalorder %s1790_s30, 0  ;;  %s38_s13 = sadd.s32 1, %s1770_s25 }
   0x7   : > { %s2076_s8 = smov (%p27_p0, %s26_s8), 0  ;;  %s2078_s9 = smov (!%p27_p0, %s29_s9), %s1786_s29 }
   0x8   : > { %p47_p3 = por %p46_p2, %p45_p1  ;;  %p31_p4 = scmp.ge.s32.totalorder %s2078_s9, 2 }
   0x9   : > { %s34_s10 = ssub.s32 %s1782_s28, %s2076_s8  ;;  %p1328_p6 = scmp.ge.s32.totalorder %s1790_s30, 4 }
   0xa   : > { %s2080_s9 = smov (%p31_p4, %s2078_s9), 0 }
   0xb   : > { %s33_s11 = ssub.s32 %s1786_s29, %s2080_s9  ;;  %245 = sbr.rel (%p1328_p6) target bundleno = 32 (0x20), region = 32 }
   0xc   : > { %s35_s12 = sor.u32 %s34_s10, %s33_s11 }
   0xd   : > { %p36_p5 = scmp.eq.s32.totalorder %s35_s12, 0 }
   0xf   : > { %s1884_s14 = scalar_select %p36_p5, %s1770_s25, %s38_s13  }
  0x10   : > { %248 = sbr.rel (!%p47_p3) target bundleno = 32 (0x20), region = 36  ;;  %s250_s15 = sand.u32 (%p47_p3), 1, %s1770_s25  }
  0x11   : > { %s1396_s16 = sshll.u32 (%p47_p3), %s1786_s29, 5  ;;  %s1329_s17 = sshll.u32 (%p47_p3), %s250_s15, 6 }
  0x12   : > { %s255_s18 = sadd.s32 (%p47_p3), %s1782_s28, %s1396_s16  ;;  %s252_s23 = scalar_lea.vmem (%p47_p3), [#allocation3], %s1329_s17 }
  0x13   : > { %s1332_s19 = sshll.u32 (%p47_p3), %s255_s18, 2 }
  0x14   : > { %s1893_s22 = scalar_lea.vmem (%p47_p3), %s2061_s0, %s1332_s19 }
  0x15   : > { %v274_v0 = vld [vmem:[%s1893_s22] sm:$0xf]  ;;  %v276_v1 = vld [vmem:[%s1893_s22 + $0x8] sm:$0xf]  ;;  %v278_v2 = vld [vmem:[%s1893_s22 + $0x10] sm:$0xf] }
  0x16   : > { %275 = vst [vmem:[%s252_s23] sm:$0xf] %v274_v0  ;;  %277 = vst [vmem:[%s252_s23 + $0x4] sm:$0xf] %v276_v1  ;;  %v280_v3 = vld [vmem:[%s1893_s22 + $0x18] sm:$0xf] }
  0x17   : > { %279 = vst [vmem:[%s252_s23 + $0x8] sm:$0xf] %v278_v2  ;;  %v282_v4 = vld [vmem:[%s1893_s22 + $0x20] sm:$0xf]  ;;  %v284_v5 = vld [vmem:[%s1893_s22 + $0x28] sm:$0xf] }
  0x18   : > { %281 = vst [vmem:[%s252_s23 + $0xc] sm:$0xf] %v280_v3  ;;  %283 = vst [vmem:[%s252_s23 + $0x10] sm:$0xf] %v282_v4  ;;  %v286_v6 = vld [vmem:[%s1893_s22 + $0x30] sm:$0xf] }
  0x19   : > { %285 = vst [vmem:[%s252_s23 + $0x14] sm:$0xf] %v284_v5  ;;  %v288_v7 = vld [vmem:[%s1893_s22 + $0x38] sm:$0xf]  ;;  %v290_v8 = vld [vmem:[%s1893_s22 + $0x40] sm:$0xf] }
  0x1a   : > { %287 = vst [vmem:[%s252_s23 + $0x18] sm:$0xf] %v286_v6  ;;  %289 = vst [vmem:[%s252_s23 + $0x1c] sm:$0xf] %v288_v7  ;;  %v292_v9 = vld [vmem:[%s1893_s22 + $0x48] sm:$0xf] }
  0x1b   : > { %291 = vst [vmem:[%s252_s23 + $0x20] sm:$0xf] %v290_v8  ;;  %v294_v10 = vld [vmem:[%s1893_s22 + $0x50] sm:$0xf]  ;;  %v296_v11 = vld [vmem:[%s1893_s22 + $0x58] sm:$0xf] }
  0x1c   : > { %293 = vst [vmem:[%s252_s23 + $0x24] sm:$0xf] %v292_v9  ;;  %295 = vst [vmem:[%s252_s23 + $0x28] sm:$0xf] %v294_v10  ;;  %v298_v12 = vld [vmem:[%s1893_s22 + $0x60] sm:$0xf] }
  0x1d   : > { %297 = vst [vmem:[%s252_s23 + $0x2c] sm:$0xf] %v296_v11  ;;  %v300_v13 = vld [vmem:[%s1893_s22 + $0x68] sm:$0xf]  ;;  %v302_v14 = vld [vmem:[%s1893_s22 + $0x70] sm:$0xf] }
  0x1e   : > { %299 = vst [vmem:[%s252_s23 + $0x30] sm:$0xf] %v298_v12  ;;  %301 = vst [vmem:[%s252_s23 + $0x34] sm:$0xf] %v300_v13  ;;  %v304_v15 = vld [vmem:[%s1893_s22 + $0x78] sm:$0xf] }
  0x1f   : > { %303 = vst [vmem:[%s252_s23 + $0x38] sm:$0xf] %v302_v14  ;;  %305 = vst [vmem:[%s252_s23 + $0x3c] sm:$0xf] %v304_v15 }
  0x20 PF: > { %p1333_p7 = scmp.ge.s32.totalorder %s1790_s30, 1  ;;  %p378_p8 = scmp.lt.s32.totalorder %s1790_s30, 5 }
  0x22   : > { %p379_p9 = pnand %p1333_p7, %p378_p8 }
  0x23   : > { %s385_s10 = sand.u32 (!%p379_p9), 1, %s1766_s24   ;;  %s1335_s11 = sshll.u32 (!%p379_p9), %s1774_s26, 4 }
  0x24   : > { %382 = sbr.rel (%p379_p9) target bundleno = 745 (0x2e9), region = 85  ;;  %s1334_s12 = sshll.u32 (!%p379_p9), %s385_s10, 6 }
  0x25   : > { %p428_p10 = scmp.lt.s32.totalorder (!%p379_p9), %s1335_s11, 31  ;;  %s1337_s13 = sshll.u32 (!%p379_p9), %s1778_s27, 4 }
  0x26   : > { %p434_p11 = scmp.lt.s32.totalorder (!%p379_p9), %s1337_s13, 31  ;;  %s1931_s27 = scalar_lea.vmem (!%p379_p9), [#allocation3], %s1334_s12 }
  0x27   : > { %p1341_p12 = scmp.ne.s32.totalorder (!%p379_p9), %s1774_s26, 0 }
  0x29   : > { %s2082_s11 = smov (!%p428_p10, %s1335_s11), 31  ;;  %s2084_s13 = smov (!%p434_p11, %s1337_s13), 31 }
  0x2a   : > { %s1336_s15 = sshll.u32 %s2082_s11, 2  ;;  %s1338_s19 = sshll.u32 %s2084_s13, 2 }
  0x2b   : > { %s1919_s18 = scalar_lea.vmem %s2062_s1, %s1336_s15  ;;  %s1924_s22 = scalar_lea.vmem %s2063_s2, %s1338_s19 }
  0x2c   : > { %s1929_s10 = scalar_lea.vmem %s2068_s7, %s1338_s19  ;;  %449 = sbr.rel (%p1341_p12) target bundleno = 58 (0x3a), region = 93 }
  0x31   : > { %vm450_vm0 = vcmask 130048   ;;  %v1792_v16 = vmov 0.0  }
  0x32   : > { %451 = vst.msk [vmem:[#allocation2] sm:$0xff] %vm450_vm0, %v1792_v16  ;;  %452 = vst.msk [vmem:[#allocation2 + $0x8] sm:$0xff] %vm450_vm0, %v1792_v16 }
  0x33   : > { %453 = vst.msk [vmem:[#allocation2 + $0x10] sm:$0xff] %vm450_vm0, %v1792_v16  ;;  %454 = vst.msk [vmem:[#allocation2 + $0x18] sm:$0xff] %vm450_vm0, %v1792_v16 }
  0x34   : > { %455 = vst.msk [vmem:[#allocation2 + $0x20] sm:$0xff] %vm450_vm0, %v1792_v16  ;;  %456 = vst.msk [vmem:[#allocation2 + $0x28] sm:$0xff] %vm450_vm0, %v1792_v16 }
  0x35   : > { %457 = vst.msk [vmem:[#allocation2 + $0x30] sm:$0xff] %vm450_vm0, %v1792_v16  ;;  %458 = vst.msk [vmem:[#allocation2 + $0x38] sm:$0xff] %vm450_vm0, %v1792_v16 }
  0x36   : > { %459 = vst.msk [vmem:[#allocation2 + $0x40] sm:$0xff] %vm450_vm0, %v1792_v16  ;;  %460 = vst.msk [vmem:[#allocation2 + $0x48] sm:$0xff] %vm450_vm0, %v1792_v16 }
  0x37   : > { %461 = vst.msk [vmem:[#allocation2 + $0x50] sm:$0xff] %vm450_vm0, %v1792_v16  ;;  %462 = vst.msk [vmem:[#allocation2 + $0x58] sm:$0xff] %vm450_vm0, %v1792_v16 }
  0x38   : > { %463 = vst.msk [vmem:[#allocation2 + $0x60] sm:$0xff] %vm450_vm0, %v1792_v16  ;;  %464 = vst.msk [vmem:[#allocation2 + $0x68] sm:$0xff] %vm450_vm0, %v1792_v16 }
  0x39   : > { %465 = vst.msk [vmem:[#allocation2 + $0x70] sm:$0xff] %vm450_vm0, %v1792_v16  ;;  %466 = vst.msk [vmem:[#allocation2 + $0x78] sm:$0xff] %vm450_vm0, %v1792_v16 }
  0x3a PF: > { %v1711_v17 = vld [vmem:[%s1919_s18 + $0x38] sm:$0xff]   ;;  %v1712_v18 = vld [vmem:[%s1919_s18 + $0x30] sm:$0xff]   ;;  %v1713_v19 = vld [vmem:[%s1919_s18 + $0x28] sm:$0xff]   ;;  %vm724_vm1 = vcmask 130048   ;;  %p1358_p13 = scmp.ne.s32.totalorder %s1774_s26, 1 }
  0x3b   : > { %1540 = vmatprep.subr.bf16.mxu0 %v1711_v17  ;;  %1622 = vmatprep.subr.bf16.mxu1 %v1711_v17  ;;  %v1714_v20 = vld [vmem:[%s1919_s18 + $0x20] sm:$0xff]   ;;  %v1715_v23 = vld [vmem:[%s1919_s18 + $0x18] sm:$0xff]   ;;  %v1716_v24 = vld [vmem:[%s1919_s18 + $0x10] sm:$0xff]  }
  0x3c   : > { %1541 = vmatpush3.bf16.msra.mxu0 %v1711_v17  ;;  %1630 = vmatpush3.bf16.msra.mxu1 %v1711_v17  ;;  %v1719_v21 = vld [vmem:[%s1931_s27] sm:$0xff]   ;;  %v1717_v25 = vld [vmem:[%s1919_s18 + $0x8] sm:$0xff]   ;;  %v1723_v29 = vld [vmem:[%s1931_s27 + $0x10] sm:$0xff]  }
  0x3d   : > { %1542 = vmatprep.subr.bf16.mxu0 %v1712_v18  ;;  %1623 = vmatprep.subr.bf16.mxu1 %v1712_v18  ;;  %v1720_v22 = vld [vmem:[%s1931_s27 + $0x20] sm:$0xff]   ;;  %v1721_v27 = vld [vmem:[%s1931_s27 + $0x8] sm:$0xff]   ;;  %v1724_v30 = vld [vmem:[%s1931_s27 + $0x30] sm:$0xff]  }
  0x3e   : > { %1556 = vmatprep.mubr.bf16.mxu0 %v1719_v21  ;;  %1564 = vmatprep.mubr.bf16.mxu1 %v1720_v22  ;;  %v1718_v26 = vld [vmem:[%s1919_s18] sm:$0xff]   ;;  %v1722_v28 = vld [vmem:[%s1931_s27 + $0x28] sm:$0xff]   ;;  %v1725_v31 = vld [vmem:[%s1931_s27 + $0x18] sm:$0xff]  }
  0x3f   : > { %v1726_v32 = vld [vmem:[%s1931_s27 + $0x38] sm:$0xff]   ;;  %v469_v33 = vld [vmem:[#allocation2 + $0x10] sm:$0xff]  ;;  %v467_v37 = vld [vmem:[#allocation2] sm:$0xff] }
  0x40   : > { %1543 = vmatpush3.bf16.msra.mxu0 %v1712_v18  ;;  %1631 = vmatpush3.bf16.msra.mxu1 %v1712_v18  ;;  %v477_v34 = vld [vmem:[#allocation2 + $0x50] sm:$0xff]  ;;  %v475_v38 = vld [vmem:[#allocation2 + $0x40] sm:$0xff]  ;;  %v470_v43 = vld [vmem:[#allocation2 + $0x18] sm:$0xff] }
  0x41   : > { %1544 = vmatprep.subr.bf16.mxu0 %v1713_v19  ;;  %1624 = vmatprep.subr.bf16.mxu1 %v1713_v19  ;;  %v478_v44 = vld [vmem:[#allocation2 + $0x58] sm:$0xff]  ;;  %v468_v49 = vld [vmem:[#allocation2 + $0x8] sm:$0xff]  ;;  %v473_v55 = vld [vmem:[#allocation2 + $0x30] sm:$0xff] }
  0x42   : > { %v476_v50 = vld [vmem:[#allocation2 + $0x48] sm:$0xff]  ;;  %v481_v56 = vld [vmem:[#allocation2 + $0x70] sm:$0xff]  ;;  %v471_v61 = vld [vmem:[#allocation2 + $0x20] sm:$0xff] }
  0x43   : > { %v479_v62 = vld [vmem:[#allocation2 + $0x60] sm:$0xff]  ;;  %v474_v3 = vld [vmem:[#allocation2 + $0x38] sm:$0xff]  ;;  %v472_v9 = vld [vmem:[#allocation2 + $0x28] sm:$0xff] }
  0x44   : > { %1545 = vmatpush3.bf16.msra.mxu0 %v1713_v19  ;;  %1632 = vmatpush3.bf16.msra.mxu1 %v1713_v19  ;;  %v482_v4 = vld [vmem:[#allocation2 + $0x78] sm:$0xff]  ;;  %v480_v10 = vld [vmem:[#allocation2 + $0x68] sm:$0xff] }
  0x45   : > { %1546 = vmatprep.subr.bf16.mxu0 %v1714_v20  ;;  %1625 = vmatprep.subr.bf16.mxu1 %v1714_v20 }
  0x48   : > { %1547 = vmatpush3.bf16.msra.mxu0 %v1714_v20  ;;  %1633 = vmatpush3.bf16.msra.mxu1 %v1714_v20 }
  0x49   : > { %1548 = vmatprep.subr.bf16.mxu0 %v1715_v23  ;;  %1626 = vmatprep.subr.bf16.mxu1 %v1715_v23 }
  0x4c   : > { %1549 = vmatpush3.bf16.msra.mxu0 %v1715_v23  ;;  %1634 = vmatpush3.bf16.msra.mxu1 %v1715_v23 }
  0x4d   : > { %1550 = vmatprep.subr.bf16.mxu0 %v1716_v24  ;;  %1627 = vmatprep.subr.bf16.mxu1 %v1716_v24 }
  0x50   : > { %1551 = vmatpush3.bf16.msra.mxu0 %v1716_v24  ;;  %1635 = vmatpush3.bf16.msra.mxu1 %v1716_v24 }
  0x51   : > { %1552 = vmatprep.subr.bf16.mxu0 %v1717_v25  ;;  %1628 = vmatprep.subr.bf16.mxu1 %v1717_v25 }
  0x54   : > { %1553 = vmatpush3.bf16.msra.mxu0 %v1717_v25  ;;  %1636 = vmatpush3.bf16.msra.mxu1 %v1717_v25 }
  0x55   : > { %1554 = vmatprep.subr.bf16.mxu0 %v1718_v26  ;;  %1629 = vmatprep.subr.bf16.mxu1 %v1718_v26 }
  0x58   : > { %1555 = vmatpush3.bf16.msra.mxu0 %v1718_v26  ;;  %1637 = vmatpush3.bf16.msra.mxu1 %v1718_v26 }
  0x5b   : > { %1557 = vmatmul.mubr.bf16.vlgmr.msra.gmra.mxu0 %v1721_v27  ;;  %1565 = vmatmul.mubr.bf16.vlgmr.msra.gmra.mxu1 %v1722_v28 }
  0x5c   : > { %1560 = vmatprep.mubr.bf16.mxu0 %v1723_v29  ;;  %1568 = vmatprep.mubr.bf16.mxu1 %v1724_v30 }
  0x63   : > { %1561 = vmatmul.mubr.bf16.gmra.mxu0 %v1725_v31  ;;  %1569 = vmatmul.mubr.bf16.gmra.mxu1 %v1726_v32 }
 0x11b   : > { %v1558_v35 = vpop.f32.mrf.mxu0  ;;  %v1566_v36 = vpop.f32.mrf.mxu1 }
 0x11c   : > { %v710_v39 = vadd.f32 %v1558_v35, %v469_v33  ;;  %v718_v40 = vadd.f32 %v1566_v36, %v477_v34 }
 0x11d   : > { %v645_v41 = vpop.f32.mrf.mxu0  ;;  %v677_v42 = vpop.f32.mrf.mxu1 }
 0x11e   : > { %727 = vst.msk [vmem:[#allocation2 + $0x10] sm:$0xff] %vm724_vm1, %v710_v39  ;;  %735 = vst.msk [vmem:[#allocation2 + $0x50] sm:$0xff] %vm724_vm1, %v718_v40  ;;  %v708_v45 = vadd.f32 %v645_v41, %v467_v37  ;;  %v716_v46 = vadd.f32 %v677_v42, %v475_v38 }
 0x11f   : > { %v1559_v47 = vpop.f32.mrf.mxu0  ;;  %v1567_v48 = vpop.f32.mrf.mxu1 }
 0x120   : > { %725 = vst.msk [vmem:[#allocation2] sm:$0xff] %vm724_vm1, %v708_v45  ;;  %733 = vst.msk [vmem:[#allocation2 + $0x40] sm:$0xff] %vm724_vm1, %v716_v46  ;;  %v711_v51 = vadd.f32 %v1559_v47, %v470_v43  ;;  %v719_v52 = vadd.f32 %v1567_v48, %v478_v44 }
 0x121   : > { %v648_v53 = vpop.f32.mrf.mxu0  ;;  %v680_v54 = vpop.f32.mrf.mxu1 }
 0x122   : > { %728 = vst.msk [vmem:[#allocation2 + $0x18] sm:$0xff] %vm724_vm1, %v711_v51  ;;  %736 = vst.msk [vmem:[#allocation2 + $0x58] sm:$0xff] %vm724_vm1, %v719_v52  ;;  %v709_v57 = vadd.f32 %v648_v53, %v468_v49  ;;  %v717_v58 = vadd.f32 %v680_v54, %v476_v50 }
 0x123   : > { %v1562_v59 = vpop.f32.mrf.mxu0  ;;  %v1570_v60 = vpop.f32.mrf.mxu1 }
 0x124   : > { %726 = vst.msk [vmem:[#allocation2 + $0x8] sm:$0xff] %vm724_vm1, %v709_v57  ;;  %734 = vst.msk [vmem:[#allocation2 + $0x48] sm:$0xff] %vm724_vm1, %v717_v58  ;;  %v714_v63 = vadd.f32 %v1562_v59, %v473_v55  ;;  %v722_v0 = vadd.f32 %v1570_v60, %v481_v56 }
 0x125   : > { %v661_v1 = vpop.f32.mrf.mxu0  ;;  %v693_v2 = vpop.f32.mrf.mxu1 }
 0x126   : > { %731 = vst.msk [vmem:[#allocation2 + $0x30] sm:$0xff] %vm724_vm1, %v714_v63  ;;  %739 = vst.msk [vmem:[#allocation2 + $0x70] sm:$0xff] %vm724_vm1, %v722_v0  ;;  %v712_v5 = vadd.f32 %v661_v1, %v471_v61  ;;  %v720_v6 = vadd.f32 %v693_v2, %v479_v62 }
 0x127   : > { %v1563_v7 = vpop.f32.mrf.mxu0  ;;  %v1571_v8 = vpop.f32.mrf.mxu1 }
 0x128   : > { %729 = vst.msk [vmem:[#allocation2 + $0x20] sm:$0xff] %vm724_vm1, %v712_v5  ;;  %737 = vst.msk [vmem:[#allocation2 + $0x60] sm:$0xff] %vm724_vm1, %v720_v6  ;;  %v715_v11 = vadd.f32 %v1563_v7, %v474_v3  ;;  %v723_v12 = vadd.f32 %v1571_v8, %v482_v4  ;;  %744 = sbr.rel (%p1358_p13) target bundleno = 745 (0x2e9), region = 97 }
 0x129   : > { %v664_v13 = vpop.f32.mrf.mxu0  ;;  %v696_v14 = vpop.f32.mrf.mxu1 }
 0x12a   : > { %732 = vst.msk [vmem:[#allocation2 + $0x38] sm:$0xff] %vm724_vm1, %v715_v11  ;;  %740 = vst.msk [vmem:[#allocation2 + $0x78] sm:$0xff] %vm724_vm1, %v723_v12  ;;  %v713_v15 = vadd.f32 %v664_v13, %v472_v9  ;;  %v721_v16 = vadd.f32 %v696_v14, %v480_v10 }
 0x12c   : > { %730 = vst.msk [vmem:[#allocation2 + $0x28] sm:$0xff] %vm724_vm1, %v713_v15  ;;  %738 = vst.msk [vmem:[#allocation2 + $0x68] sm:$0xff] %vm724_vm1, %v721_v16 }
 0x12d   : > { %v1727_v17 = vld [vmem:[%s2064_s3] sm:$0xff]   ;;  %v746_v19 = vld [vmem:[#allocation2 + $0x8] sm:$0xff]  ;;  %v747_v23 = vld [vmem:[#allocation2 + $0x10] sm:$0xff] }
 0x12e   : > { %v745_v18 = vld [vmem:[#allocation2] sm:$0xff]  ;;  %1572 = vmatprep.subr.bf16.mxu0 %v1727_v17  ;;  %v748_v24 = vld [vmem:[#allocation2 + $0x18] sm:$0xff]  ;;  %v1485_v25 = vld [vmem:[%s1924_s22 + $0x8] sm:$0xff]  }
 0x12f   : > { %v1414_v20 = vld [vmem:[%s1924_s22] sm:$0xff]   ;;  %1573 = vmatpush3.bf16.msra.mxu0 %v1727_v17  ;;  %v1419_v26 = vunpack.c.l.bf16 %v1485_v25  ;;  %v1420_v27 = vunpack.c.h.bf16 %v1485_v25  ;;  %v1486_v30 = vld [vmem:[%s1924_s22 + $0x10] sm:$0xff]   ;;  %v1487_v35 = vld [vmem:[%s1924_s22 + $0x18] sm:$0xff]  }
 0x130   : > { %v1415_v21 = vunpack.c.l.bf16 %v1414_v20  ;;  %v1416_v22 = vunpack.c.h.bf16 %v1414_v20  ;;  %v749_v28 = vld [vmem:[#allocation2 + $0x20] sm:$0xff]  ;;  %v1423_v33 = vunpack.c.l.bf16 %v1486_v30  ;;  %v1424_v34 = vunpack.c.h.bf16 %v1486_v30  ;;  %v751_v44 = vld [vmem:[#allocation2 + $0x30] sm:$0xff]  ;;  %v754_v49 = vld [vmem:[#allocation2 + $0x48] sm:$0xff] }
 0x131   : > { %v795_v36 = vadd.f32 %v1419_v26, %v747_v23  ;;  %v796_v37 = vadd.f32 %v1420_v27, %v748_v24  ;;  %v1427_v38 = vunpack.c.l.bf16 %v1487_v35  ;;  %v1428_v39 = vunpack.c.h.bf16 %v1487_v35  ;;  %v1488_v40 = vld [vmem:[%s1924_s22 + $0x20] sm:$0xff]   ;;  %v752_v45 = vld [vmem:[#allocation2 + $0x38] sm:$0xff]  ;;  %v1489_v52 = vld [vmem:[%s1924_s22 + $0x28] sm:$0xff]  }
 0x132   : > { %v793_v31 = vadd.f32 %v1415_v21, %v745_v18  ;;  %v794_v32 = vadd.f32 %v1416_v22, %v746_v19  ;;  %v797_v42 = vadd.f32 %v1423_v33, %v749_v28  ;;  %v1431_v46 = vunpack.c.l.bf16 %v1488_v40  ;;  %v753_v48 = vld [vmem:[#allocation2 + $0x40] sm:$0xff]  ;;  %v1728_v55 = vld [vmem:[%s2066_s5 + $0x38] sm:$0xff]   ;;  %v1729_v58 = vld [vmem:[%s2066_s5 + $0x30] sm:$0xff]  }
 0x133   : > { %v750_v29 = vld [vmem:[#allocation2 + $0x28] sm:$0xff]  ;;  %v810_v47 = vpack.c.bf16 %v796_v37, %v795_v36  ;;  %v1432_v50 = vunpack.c.h.bf16 %v1488_v40  ;;  %v799_v53 = vadd.f32 %v1427_v38, %v751_v44  ;;  %v800_v54 = vadd.f32 %v1428_v39, %v752_v45  ;;  %v1490_v59 = vld [vmem:[%s1924_s22 + $0x30] sm:$0xff]   ;;  %1590 = vmatprep.subr.bf16.mxu0 %v1728_v55  ;;  %1638 = vmatprep.subr.bf16.mxu1 %v1728_v55  ;;  %v756_v61 = vld [vmem:[#allocation2 + $0x58] sm:$0xff] }
 0x134   : > { %v809_v41 = vpack.c.bf16 %v794_v32, %v793_v31  ;;  %v798_v43 = vadd.f32 %v1424_v34, %v750_v29  ;;  %v801_v56 = vadd.f32 %v1431_v46, %v753_v48  ;;  %v755_v60 = vld [vmem:[#allocation2 + $0x50] sm:$0xff]  ;;  %1646 = vmatpush3.bf16.msra.mxu1 %v1728_v55  ;;  %v1435_v63 = vunpack.c.l.bf16 %v1489_v52  ;;  %v757_v1 = vld [vmem:[#allocation2 + $0x60] sm:$0xff]  ;;  %v758_v2 = vld [vmem:[#allocation2 + $0x68] sm:$0xff] }
 0x135   : > { %v802_v57 = vadd.f32 %v1432_v50, %v754_v49  ;;  %v812_v62 = vpack.c.bf16 %v800_v54, %v799_v53  ;;  %v1436_v0 = vunpack.c.h.bf16 %v1489_v52  ;;  %v1730_v3 = vld [vmem:[%s2066_s5 + $0x28] sm:$0xff]   ;;  %1639 = vmatprep.subr.bf16.mxu1 %v1729_v58  ;;  %v1439_v5 = vunpack.c.l.bf16 %v1490_v59  ;;  %v1731_v9 = vld [vmem:[%s2066_s5 + $0x20] sm:$0xff]   ;;  %v1491_v12 = vld [vmem:[%s1924_s22 + $0x38] sm:$0xff]  }
 0x136   : > { %1574 = vmatprep.mubr.msk.bf16.mxu0 %vm724_vm1, %v809_v41  ;;  %v811_v51 = vpack.c.bf16 %v798_v43, %v797_v42  ;;  %v1440_v6 = vunpack.c.h.bf16 %v1490_v59  ;;  %v803_v7 = vadd.f32 %v1435_v63, %v755_v60  ;;  %v1443_v14 = vunpack.c.l.bf16 %v1491_v12  ;;  %v1732_v16 = vld [vmem:[%s2066_s5 + $0x18] sm:$0xff]   ;;  %v759_v18 = vld [vmem:[#allocation2 + $0x70] sm:$0xff]  ;;  %v1734_v24 = vld [vmem:[%s2066_s5 + $0x8] sm:$0xff]  }
 0x137   : > { %1575 = vmatmul.mubr.msk.bf16.vlgmr.msra.gmra.mxu0 %vm724_vm1, %v810_v47  ;;  %v813_v4 = vpack.c.bf16 %v802_v57, %v801_v56  ;;  %v804_v8 = vadd.f32 %v1436_v0, %v756_v61  ;;  %v805_v10 = vadd.f32 %v1439_v5, %v757_v1  ;;  %v1444_v15 = vunpack.c.h.bf16 %v1491_v12  ;;  %v760_v19 = vld [vmem:[#allocation2 + $0x78] sm:$0xff]  ;;  %v1733_v23 = vld [vmem:[%s2066_s5 + $0x10] sm:$0xff]   ;;  %v1735_v25 = vld [vmem:[%s2066_s5] sm:$0xff]  }
 0x138   : > { %1578 = vmatprep.mubr.msk.bf16.mxu0 %vm724_vm1, %v811_v51  ;;  %1591 = vmatpush3.bf16.msra.mxu0 %v1728_v55  ;;  %v806_v11 = vadd.f32 %v1440_v6, %v758_v2  ;;  %v807_v20 = vadd.f32 %v1443_v14, %v759_v18  ;;  %v1359_v28 = vld [vmem:[%s2065_s4] ss:$0 sm:$0xff] }
 0x139   : > { %1592 = vmatprep.subr.bf16.mxu0 %v1729_v58  ;;  %1647 = vmatpush3.bf16.msra.mxu1 %v1729_v58  ;;  %v814_v13 = vpack.c.bf16 %v804_v8, %v803_v7  ;;  %v808_v21 = vadd.f32 %v1444_v15, %v760_v19 }
 0x13a   : > { %1640 = vmatprep.subr.bf16.mxu1 %v1730_v3  ;;  %v815_v17 = vpack.c.bf16 %v806_v11, %v805_v10 }
 0x13b   : > { %v816_v22 = vpack.c.bf16 %v808_v21, %v807_v20  ;;  %v1369_v20 = vld [vmem:[%s2067_s6] ss:$0 sm:$0xff] }
 0x13c   : > { %1593 = vmatpush3.bf16.msra.mxu0 %v1729_v58 }
 0x13d   : > { %1594 = vmatprep.subr.bf16.mxu0 %v1730_v3  ;;  %1648 = vmatpush3.bf16.msra.mxu1 %v1730_v3 }
 0x13e   : > { %1641 = vmatprep.subr.bf16.mxu1 %v1731_v9 }
 0x13f   : > { %1579 = vmatmul.mubr.msk.bf16.gmra.mxu0 %vm724_vm1, %v812_v62 }
 0x140   : > { %1582 = vmatprep.mubr.msk.bf16.mxu0 %vm724_vm1, %v813_v4  ;;  %1595 = vmatpush3.bf16.msra.mxu0 %v1730_v3 }
 0x141   : > { %1596 = vmatprep.subr.bf16.mxu0 %v1731_v9  ;;  %1649 = vmatpush3.bf16.msra.mxu1 %v1731_v9 }
 0x142   : > { %1642 = vmatprep.subr.bf16.mxu1 %v1732_v16 }
 0x144   : > { %1597 = vmatpush3.bf16.msra.mxu0 %v1731_v9 }
 0x145   : > { %1598 = vmatprep.subr.bf16.mxu0 %v1732_v16  ;;  %1650 = vmatpush3.bf16.msra.mxu1 %v1732_v16 }
 0x146   : > { %1643 = vmatprep.subr.bf16.mxu1 %v1733_v23 }
 0x147   : > { %1583 = vmatmul.mubr.msk.bf16.gmra.mxu0 %vm724_vm1, %v814_v13 }
 0x148   : > { %1586 = vmatprep.mubr.msk.bf16.mxu0 %vm724_vm1, %v815_v17  ;;  %1599 = vmatpush3.bf16.msra.mxu0 %v1732_v16 }
 0x149   : > { %1600 = vmatprep.subr.bf16.mxu0 %v1733_v23  ;;  %1651 = vmatpush3.bf16.msra.mxu1 %v1733_v23 }
 0x14a   : > { %1644 = vmatprep.subr.bf16.mxu1 %v1734_v24 }
 0x14c   : > { %1601 = vmatpush3.bf16.msra.mxu0 %v1733_v23 }
 0x14d   : > { %1602 = vmatprep.subr.bf16.mxu0 %v1734_v24  ;;  %1652 = vmatpush3.bf16.msra.mxu1 %v1734_v24 }
 0x14e   : > { %1645 = vmatprep.subr.bf16.mxu1 %v1735_v25 }
 0x14f   : > { %1587 = vmatmul.mubr.msk.bf16.gmra.mxu0 %vm724_vm1, %v816_v22 }
 0x150   : > { %1603 = vmatpush3.bf16.msra.mxu0 %v1734_v24 }
 0x151   : > { %1604 = vmatprep.subr.bf16.mxu0 %v1735_v25  ;;  %1653 = vmatpush3.bf16.msra.mxu1 %v1735_v25 }
 0x154   : > { %1605 = vmatpush3.bf16.msra.mxu0 %v1735_v25 }
 0x1f7   : > { %v1576_v26 = vpop.f32.mrf.mxu0 }
 0x1f8   : > { %v899_v32 = vadd.f32 %v1576_v26, %v1359_v28 }
 0x1f9   : > { %v890_v27 = vpop.f32.mrf.mxu0 }
 0x1fa   : > { %v891_v30 = vadd.f32 %v1359_v28, %v890_v27  ;;  %v955_v39 = vmax.f32 %v899_v32, 0.0 }
 0x1fb   : > { %v1577_v29 = vpop.f32.mrf.mxu0 }
 0x1fc   : > { %v902_v31 = vadd.f32 %v1577_v29, %v1359_v28  ;;  %v953_v37 = vmax.f32 %v891_v30, 0.0 }
 0x1fd   : > { %v893_v33 = vpop.f32.mrf.mxu0 }
 0x1fe   : > { %v894_v34 = vadd.f32 %v1359_v28, %v893_v33  ;;  %v956_v35 = vmax.f32 %v902_v31, 0.0 }
 0x1ff   : > { %v1580_v36 = vpop.f32.mrf.mxu0 }
 0x200   : > { %v954_v38 = vmax.f32 %v894_v34, 0.0  ;;  %v970_v42 = vpack.c.bf16 %v956_v35, %v955_v39  ;;  %v915_v46 = vadd.f32 %v1580_v36, %v1359_v28 }
 0x201   : > { %v906_v40 = vpop.f32.mrf.mxu0 }
 0x202   : > { %v969_v41 = vpack.c.bf16 %v954_v38, %v953_v37  ;;  %v907_v44 = vadd.f32 %v1359_v28, %v906_v40  ;;  %v959_v53 = vmax.f32 %v915_v46, 0.0 }
 0x203   : > { %v1581_v43 = vpop.f32.mrf.mxu0 }
 0x204   : > { %v918_v45 = vadd.f32 %v1581_v43, %v1359_v28  ;;  %1606 = vmatprep.mubr.bf16.mxu0 %v969_v41  ;;  %v957_v51 = vmax.f32 %v907_v44, 0.0 }
 0x205   : > { %v909_v47 = vpop.f32.mrf.mxu0  ;;  %1607 = vmatmul.mubr.bf16.vlgmr.msra.gmra.mxu0 %v970_v42 }
 0x206   : > { %v910_v48 = vadd.f32 %v1359_v28, %v909_v47  ;;  %v960_v49 = vmax.f32 %v918_v45, 0.0 }
 0x207   : > { %v1584_v50 = vpop.f32.mrf.mxu0 }
 0x208   : > { %v958_v52 = vmax.f32 %v910_v48, 0.0  ;;  %v972_v56 = vpack.c.bf16 %v960_v49, %v959_v53  ;;  %v931_v60 = vadd.f32 %v1584_v50, %v1359_v28 }
 0x209   : > { %v922_v54 = vpop.f32.mrf.mxu0 }
 0x20a   : > { %v971_v55 = vpack.c.bf16 %v958_v52, %v957_v51  ;;  %v923_v58 = vadd.f32 %v1359_v28, %v922_v54  ;;  %v963_v3 = vmax.f32 %v931_v60, 0.0 }
 0x20b   : > { %v1585_v57 = vpop.f32.mrf.mxu0 }
 0x20c   : > { %v934_v59 = vadd.f32 %v1585_v57, %v1359_v28  ;;  %1610 = vmatprep.mubr.bf16.mxu1 %v971_v55  ;;  %v961_v1 = vmax.f32 %v923_v58, 0.0 }
 0x20d   : > { %v925_v61 = vpop.f32.mrf.mxu0  ;;  %1611 = vmatmul.mubr.bf16.vlgmr.msra.gmra.mxu1 %v972_v56 }
 0x20e   : > { %v926_v62 = vadd.f32 %v1359_v28, %v925_v61  ;;  %v964_v63 = vmax.f32 %v934_v59, 0.0 }
 0x20f   : > { %v1588_v0 = vpop.f32.mrf.mxu0 }
 0x210   : > { %v962_v2 = vmax.f32 %v926_v62, 0.0  ;;  %v974_v6 = vpack.c.bf16 %v964_v63, %v963_v3  ;;  %v947_v10 = vadd.f32 %v1588_v0, %v1359_v28 }
 0x211   : > { %v938_v4 = vpop.f32.mrf.mxu0 }
 0x212   : > { %v973_v5 = vpack.c.bf16 %v962_v2, %v961_v1  ;;  %v939_v8 = vadd.f32 %v1359_v28, %v938_v4  ;;  %v967_v16 = vmax.f32 %v947_v10, 0.0 }
 0x213   : > { %v1589_v7 = vpop.f32.mrf.mxu0 }
 0x214   : > { %v950_v9 = vadd.f32 %v1589_v7, %v1359_v28  ;;  %1614 = vmatprep.mubr.bf16.mxu1 %v973_v5  ;;  %v965_v14 = vmax.f32 %v939_v8, 0.0 }
 0x215   : > { %v941_v11 = vpop.f32.mrf.mxu0  ;;  %1615 = vmatmul.mubr.bf16.gmra.mxu1 %v974_v6 }
 0x216   : > { %v942_v12 = vadd.f32 %v1359_v28, %v941_v11  ;;  %v968_v13 = vmax.f32 %v950_v9, 0.0 }
 0x218   : > { %v966_v15 = vmax.f32 %v942_v12, 0.0  ;;  %v976_v18 = vpack.c.bf16 %v968_v13, %v967_v16 }
 0x21a   : > { %v975_v17 = vpack.c.bf16 %v966_v15, %v965_v14 }
 0x21c   : > { %1618 = vmatprep.mubr.bf16.mxu1 %v975_v17 }
 0x21d   : > { %1619 = vmatmul.mubr.bf16.gmra.mxu1 %v976_v18 }
 0x2c5   : > { %v1608_v19 = vpop.f32.mrf.mxu0 }
 0x2c6   : > { %v1091_v23 = vadd.f32 %v1608_v19, %v1369_v20 }
 0x2c7   : > { %v1082_v21 = vpop.f32.mrf.mxu0 }
 0x2c8   : > { %v1083_v26 = vadd.f32 %v1369_v20, %v1082_v21 }
 0x2c9   : > { %v1609_v22 = vpop.f32.mrf.mxu0 }
 0x2ca   : > { %v1094_v24 = vadd.f32 %v1609_v22, %v1369_v20 }
 0x2cb   : > { %v1085_v25 = vpop.f32.mrf.mxu0 }
 0x2cc   : > { %v1453_v27 = vpack.c.bf16 %v1094_v24, %v1091_v23  ;;  %v1086_v28 = vadd.f32 %v1369_v20, %v1085_v25 }
 0x2cd   : > { %v1612_v29 = vpop.f32.mrf.mxu1 }
 0x2ce   : > { %1492 = vst [vmem:[%s1929_s10 + $0x8] sm:$0xff] %v1453_v27   ;;  %v1448_v30 = vpack.c.bf16 %v1086_v28, %v1083_v26  ;;  %v1107_v33 = vadd.f32 %v1612_v29, %v1369_v20 }
 0x2cf   : > { %v1098_v31 = vpop.f32.mrf.mxu1 }
 0x2d0   : > { %1449 = vst [vmem:[%s1929_s10] sm:$0xff] %v1448_v30   ;;  %v1099_v36 = vadd.f32 %v1369_v20, %v1098_v31 }
 0x2d1   : > { %v1613_v32 = vpop.f32.mrf.mxu1 }
 0x2d2   : > { %v1110_v34 = vadd.f32 %v1613_v32, %v1369_v20 }
 0x2d3   : > { %v1101_v35 = vpop.f32.mrf.mxu1 }
 0x2d4   : > { %v1463_v37 = vpack.c.bf16 %v1110_v34, %v1107_v33  ;;  %v1102_v38 = vadd.f32 %v1369_v20, %v1101_v35 }
 0x2d5   : > { %v1616_v39 = vpop.f32.mrf.mxu1 }
 0x2d6   : > { %1494 = vst [vmem:[%s1929_s10 + $0x18] sm:$0xff] %v1463_v37   ;;  %v1458_v40 = vpack.c.bf16 %v1102_v38, %v1099_v36  ;;  %v1123_v43 = vadd.f32 %v1616_v39, %v1369_v20 }
 0x2d7   : > { %v1114_v41 = vpop.f32.mrf.mxu1 }
 0x2d8   : > { %1493 = vst [vmem:[%s1929_s10 + $0x10] sm:$0xff] %v1458_v40   ;;  %v1115_v46 = vadd.f32 %v1369_v20, %v1114_v41 }
 0x2d9   : > { %v1617_v42 = vpop.f32.mrf.mxu1 }
 0x2da   : > { %v1126_v44 = vadd.f32 %v1617_v42, %v1369_v20 }
 0x2db   : > { %v1117_v45 = vpop.f32.mrf.mxu1 }
 0x2dc   : > { %v1473_v47 = vpack.c.bf16 %v1126_v44, %v1123_v43  ;;  %v1118_v48 = vadd.f32 %v1369_v20, %v1117_v45 }
 0x2dd   : > { %v1620_v49 = vpop.f32.mrf.mxu1 }
 0x2de   : > { %1496 = vst [vmem:[%s1929_s10 + $0x28] sm:$0xff] %v1473_v47   ;;  %v1468_v50 = vpack.c.bf16 %v1118_v48, %v1115_v46  ;;  %v1139_v53 = vadd.f32 %v1620_v49, %v1369_v20 }
 0x2df   : > { %v1130_v51 = vpop.f32.mrf.mxu1 }
 0x2e0   : > { %1495 = vst [vmem:[%s1929_s10 + $0x20] sm:$0xff] %v1468_v50   ;;  %v1131_v56 = vadd.f32 %v1369_v20, %v1130_v51 }
 0x2e1   : > { %v1621_v52 = vpop.f32.mrf.mxu1 }
 0x2e2   : > { %v1142_v54 = vadd.f32 %v1621_v52, %v1369_v20 }
 0x2e3   : > { %v1133_v55 = vpop.f32.mrf.mxu1 }
 0x2e4   : > { %v1483_v57 = vpack.c.bf16 %v1142_v54, %v1139_v53  ;;  %v1134_v58 = vadd.f32 %v1369_v20, %v1133_v55 }
 0x2e6   : > { %1498 = vst [vmem:[%s1929_s10 + $0x38] sm:$0xff] %v1483_v57   ;;  %v1478_v59 = vpack.c.bf16 %v1134_v58, %v1131_v56 }
 0x2e8   : > { %1497 = vst [vmem:[%s1929_s10 + $0x30] sm:$0xff] %v1478_v59  }
 0x2e9 PF: > { %s17_s30 = sadd.s32 1, %s1790_s30   ;;  %s2069_s24 = smov %s1770_s25 }
 0x2ea   : > { %p14_p0 = scmp.ge.s32.totalorder %s17_s30, 6   ;;  %s2070_s25 = smov %s1884_s14 }
 0x2eb   : > { %s2071_s26 = smov %s1782_s28  ;;  %s2072_s27 = smov %s1786_s29 }
 0x2ec   : > { %s2073_s28 = smov %s2076_s8  ;;  %s2074_s29 = smov %s2080_s9 }
 0x2ed   :  { %16 = sbr.rel (!%p14_p0) target bundleno = 4 (0x4), region = 138 }

// kernel: gin_forward.4
= control target key start
LH: loop header
LB: loop body
LE: loop exit
PB: predicated region body
PF: predicated region fallthrough
CT: control target
= control target key end

     0   :  { %s1874_s24 = smov 0   ;;  %s1876_s25 = smov 0   ;;  %s2083_s0 = inlined_call_operand.vmem [shape: bf16[256,256], index: 0, kind: input, shape index: {}]   ;;  %s2084_s1 = inlined_call_operand.vmem [shape: bf16[256,128], index: 1, kind: input, shape index: {}, may-alias: {1,2}]   ;;  %s2085_s2 = inlined_call_operand.vmem [shape: bf16[256,128], index: 2, kind: input, shape index: {}, may-alias: {1,2}]   ;;  %s2086_s3 = inlined_call_operand.vmem [shape: bf16[128,128], index: 3, kind: input, shape index: {}]   ;;  %s2087_s4 = inlined_call_operand.vmem [shape: f32[1,128], index: 4, kind: input, shape index: {}]   ;;  %s2088_s5 = inlined_call_operand.vmem [shape: bf16[128,128], index: 5, kind: input, shape index: {}]   ;;  %s2089_s6 = inlined_call_operand.vmem [shape: f32[1,128], index: 6, kind: input, shape index: {}]   ;;  %s2090_s7 = inlined_call_operand.vmem [shape: bf16[256,128], index: 7, kind: output, shape index: {}]  }
   0x1   :  { %s1878_s26 = smov 0   ;;  %s1880_s27 = smov 0  }
   0x2   :  { %s1882_s28 = smov 0   ;;  %s1884_s29 = smov 0  }
   0x3   :  { %s1886_s30 = smov 0  }
   0x4 LB: > { %s26_s8 = sadd.s32 1, %s1823_s28  ;;  %s29_s9 = sadd.s32 1, %s1827_s29  ;;  %s1831_s30 = sphi %s1886_s30, %s17_s30   ;;  %s1827_s29 = sphi %s1884_s29, %s2096_s29   ;;  %s1823_s28 = sphi %s1882_s28, %s2095_s28   ;;  %s1819_s27 = sphi %s1880_s27, %s2094_s27   ;;  %s1815_s26 = sphi %s1878_s26, %s2093_s26   ;;  %s1811_s25 = sphi %s1876_s25, %s2092_s25   ;;  %s1807_s24 = sphi %s1874_s24, %s2091_s24  }
   0x5   : > { %p27_p0 = scmp.ge.s32.totalorder %s26_s8, 2  ;;  %p45_p1 = scmp.ne.s32.totalorder %s1811_s25, %s1807_s24 }
   0x6   : > { %p46_p2 = scmp.eq.s32.totalorder %s1831_s30, 0  ;;  %s38_s13 = sadd.s32 1, %s1811_s25 }
   0x7   : > { %s2098_s8 = smov (%p27_p0, %s26_s8), 0  ;;  %s2100_s9 = smov (!%p27_p0, %s29_s9), %s1827_s29 }
   0x8   : > { %p47_p3 = por %p46_p2, %p45_p1  ;;  %p31_p4 = scmp.ge.s32.totalorder %s2100_s9, 2 }
   0x9   : > { %s34_s10 = ssub.s32 %s1823_s28, %s2098_s8  ;;  %p1358_p6 = scmp.ge.s32.totalorder %s1831_s30, 4 }
   0xa   : > { %s2102_s9 = smov (%p31_p4, %s2100_s9), 0 }
   0xb   : > { %s33_s11 = ssub.s32 %s1827_s29, %s2102_s9  ;;  %245 = sbr.rel (%p1358_p6) target bundleno = 32 (0x20), region = 32 }
   0xc   : > { %s35_s12 = sor.u32 %s34_s10, %s33_s11 }
   0xd   : > { %p36_p5 = scmp.eq.s32.totalorder %s35_s12, 0 }
   0xf   : > { %s1925_s14 = scalar_select %p36_p5, %s1811_s25, %s38_s13  }
  0x10   : > { %248 = sbr.rel (!%p47_p3) target bundleno = 32 (0x20), region = 36  ;;  %s250_s15 = sand.u32 (%p47_p3), 1, %s1811_s25  }
  0x11   : > { %s1425_s16 = sshll.u32 (%p47_p3), %s1827_s29, 5  ;;  %s1359_s17 = sshll.u32 (%p47_p3), %s250_s15, 6 }
  0x12   : > { %s255_s18 = sadd.s32 (%p47_p3), %s1823_s28, %s1425_s16  ;;  %s252_s23 = scalar_lea.vmem (%p47_p3), [#allocation3], %s1359_s17 }
  0x13   : > { %s1362_s19 = sshll.u32 (%p47_p3), %s255_s18, 2 }
  0x14   : > { %s1934_s22 = scalar_lea.vmem (%p47_p3), %s2083_s0, %s1362_s19 }
  0x15   : > { %v274_v0 = vld [vmem:[%s1934_s22] sm:$0xf]  ;;  %v276_v1 = vld [vmem:[%s1934_s22 + $0x8] sm:$0xf]  ;;  %v278_v2 = vld [vmem:[%s1934_s22 + $0x10] sm:$0xf] }
  0x16   : > { %275 = vst [vmem:[%s252_s23] sm:$0xf] %v274_v0  ;;  %277 = vst [vmem:[%s252_s23 + $0x4] sm:$0xf] %v276_v1  ;;  %v280_v3 = vld [vmem:[%s1934_s22 + $0x18] sm:$0xf] }
  0x17   : > { %279 = vst [vmem:[%s252_s23 + $0x8] sm:$0xf] %v278_v2  ;;  %v282_v4 = vld [vmem:[%s1934_s22 + $0x20] sm:$0xf]  ;;  %v284_v5 = vld [vmem:[%s1934_s22 + $0x28] sm:$0xf] }
  0x18   : > { %281 = vst [vmem:[%s252_s23 + $0xc] sm:$0xf] %v280_v3  ;;  %283 = vst [vmem:[%s252_s23 + $0x10] sm:$0xf] %v282_v4  ;;  %v286_v6 = vld [vmem:[%s1934_s22 + $0x30] sm:$0xf] }
  0x19   : > { %285 = vst [vmem:[%s252_s23 + $0x14] sm:$0xf] %v284_v5  ;;  %v288_v7 = vld [vmem:[%s1934_s22 + $0x38] sm:$0xf]  ;;  %v290_v8 = vld [vmem:[%s1934_s22 + $0x40] sm:$0xf] }
  0x1a   : > { %287 = vst [vmem:[%s252_s23 + $0x18] sm:$0xf] %v286_v6  ;;  %289 = vst [vmem:[%s252_s23 + $0x1c] sm:$0xf] %v288_v7  ;;  %v292_v9 = vld [vmem:[%s1934_s22 + $0x48] sm:$0xf] }
  0x1b   : > { %291 = vst [vmem:[%s252_s23 + $0x20] sm:$0xf] %v290_v8  ;;  %v294_v10 = vld [vmem:[%s1934_s22 + $0x50] sm:$0xf]  ;;  %v296_v11 = vld [vmem:[%s1934_s22 + $0x58] sm:$0xf] }
  0x1c   : > { %293 = vst [vmem:[%s252_s23 + $0x24] sm:$0xf] %v292_v9  ;;  %295 = vst [vmem:[%s252_s23 + $0x28] sm:$0xf] %v294_v10  ;;  %v298_v12 = vld [vmem:[%s1934_s22 + $0x60] sm:$0xf] }
  0x1d   : > { %297 = vst [vmem:[%s252_s23 + $0x2c] sm:$0xf] %v296_v11  ;;  %v300_v13 = vld [vmem:[%s1934_s22 + $0x68] sm:$0xf]  ;;  %v302_v14 = vld [vmem:[%s1934_s22 + $0x70] sm:$0xf] }
  0x1e   : > { %299 = vst [vmem:[%s252_s23 + $0x30] sm:$0xf] %v298_v12  ;;  %301 = vst [vmem:[%s252_s23 + $0x34] sm:$0xf] %v300_v13  ;;  %v304_v15 = vld [vmem:[%s1934_s22 + $0x78] sm:$0xf] }
  0x1f   : > { %303 = vst [vmem:[%s252_s23 + $0x38] sm:$0xf] %v302_v14  ;;  %305 = vst [vmem:[%s252_s23 + $0x3c] sm:$0xf] %v304_v15 }
  0x20 PF: > { %p1363_p7 = scmp.ge.s32.totalorder %s1831_s30, 1  ;;  %p378_p8 = scmp.lt.s32.totalorder %s1831_s30, 5 }
  0x22   : > { %p379_p9 = pnand %p1363_p7, %p378_p8 }
  0x23   : > { %s385_s10 = sand.u32 (!%p379_p9), 1, %s1807_s24   ;;  %s1365_s11 = sshll.u32 (!%p379_p9), %s1815_s26, 4 }
  0x24   : > { %382 = sbr.rel (%p379_p9) target bundleno = 768 (0x300), region = 85  ;;  %s1364_s12 = sshll.u32 (!%p379_p9), %s385_s10, 6 }
  0x25   : > { %p428_p10 = scmp.lt.s32.totalorder (!%p379_p9), %s1365_s11, 31  ;;  %s1367_s13 = sshll.u32 (!%p379_p9), %s1819_s27, 4 }
  0x26   : > { %p434_p11 = scmp.lt.s32.totalorder (!%p379_p9), %s1367_s13, 31  ;;  %s1972_s27 = scalar_lea.vmem (!%p379_p9), [#allocation3], %s1364_s12 }
  0x27   : > { %p1371_p12 = scmp.ne.s32.totalorder (!%p379_p9), %s1815_s26, 0 }
  0x29   : > { %s2104_s11 = smov (!%p428_p10, %s1365_s11), 31  ;;  %s2106_s13 = smov (!%p434_p11, %s1367_s13), 31 }
  0x2a   : > { %s1366_s15 = sshll.u32 %s2104_s11, 2  ;;  %s1368_s19 = sshll.u32 %s2106_s13, 2 }
  0x2b   : > { %s1960_s18 = scalar_lea.vmem %s2084_s1, %s1366_s15  ;;  %s1965_s22 = scalar_lea.vmem %s2085_s2, %s1368_s19 }
  0x2c   : > { %s1970_s10 = scalar_lea.vmem %s2090_s7, %s1368_s19  ;;  %449 = sbr.rel (%p1371_p12) target bundleno = 58 (0x3a), region = 93 }
  0x31   : > { %v1833_v16 = vmov 0.0  }
  0x32   : > { %450 = vst [vmem:[#allocation2 + $0x30] sm:$0xff] %v1833_v16  ;;  %451 = vst [vmem:[#allocation2] sm:$0xff] %v1833_v16 }
  0x33   : > { %452 = vst [vmem:[#allocation2 + $0x58] sm:$0xff] %v1833_v16  ;;  %453 = vst [vmem:[#allocation2 + $0x18] sm:$0xff] %v1833_v16 }
  0x34   : > { %454 = vst [vmem:[#allocation2 + $0x50] sm:$0xff] %v1833_v16  ;;  %455 = vst [vmem:[#allocation2 + $0x68] sm:$0xff] %v1833_v16 }
  0x35   : > { %456 = vst [vmem:[#allocation2 + $0x8] sm:$0xff] %v1833_v16  ;;  %457 = vst [vmem:[#allocation2 + $0x48] sm:$0xff] %v1833_v16 }
  0x36   : > { %458 = vst [vmem:[#allocation2 + $0x40] sm:$0xff] %v1833_v16  ;;  %459 = vst [vmem:[#allocation2 + $0x20] sm:$0xff] %v1833_v16 }
  0x37   : > { %460 = vst [vmem:[#allocation2 + $0x10] sm:$0xff] %v1833_v16  ;;  %461 = vst [vmem:[#allocation2 + $0x38] sm:$0xff] %v1833_v16 }
  0x38   : > { %462 = vst [vmem:[#allocation2 + $0x60] sm:$0xff] %v1833_v16  ;;  %463 = vst [vmem:[#allocation2 + $0x70] sm:$0xff] %v1833_v16 }
  0x39   : > { %464 = vst [vmem:[#allocation2 + $0x78] sm:$0xff] %v1833_v16  ;;  %465 = vst [vmem:[#allocation2 + $0x28] sm:$0xff] %v1833_v16 }
  0x3a PF: > { %v1745_v17 = vld [vmem:[%s1960_s18 + $0x38] sm:$0xff]   ;;  %v1746_v18 = vld [vmem:[%s1960_s18 + $0x30] sm:$0xff]   ;;  %v1747_v19 = vld [vmem:[%s1960_s18 + $0x28] sm:$0xff]   ;;  %p1388_p13 = scmp.ne.s32.totalorder %s1815_s26, 1 }
  0x3b   : > { %1576 = vmatprep.subr.bf16.mxu0 %v1745_v17  ;;  %1672 = vmatprep.subr.bf16.mxu1 %v1745_v17  ;;  %v1748_v20 = vld [vmem:[%s1960_s18 + $0x20] sm:$0xff]   ;;  %v1749_v23 = vld [vmem:[%s1960_s18 + $0x18] sm:$0xff]   ;;  %v1750_v24 = vld [vmem:[%s1960_s18 + $0x10] sm:$0xff]  }
  0x3c   : > { %1577 = vmatpush3.bf16.msra.mxu0 %v1745_v17  ;;  %1680 = vmatpush3.bf16.msra.mxu1 %v1745_v17  ;;  %v1753_v21 = vld [vmem:[%s1972_s27] sm:$0xff]   ;;  %v1751_v25 = vld [vmem:[%s1960_s18 + $0x8] sm:$0xff]   ;;  %v1757_v29 = vld [vmem:[%s1972_s27 + $0x10] sm:$0xff]  }
  0x3d   : > { %1578 = vmatprep.subr.bf16.mxu0 %v1746_v18  ;;  %1673 = vmatprep.subr.bf16.mxu1 %v1746_v18  ;;  %v1754_v22 = vld [vmem:[%s1972_s27 + $0x20] sm:$0xff]   ;;  %v1755_v27 = vld [vmem:[%s1972_s27 + $0x8] sm:$0xff]   ;;  %v1758_v30 = vld [vmem:[%s1972_s27 + $0x30] sm:$0xff]  }
  0x3e   : > { %1592 = vmatprep.mubr.bf16.mxu0 %v1753_v21  ;;  %1600 = vmatprep.mubr.bf16.mxu1 %v1754_v22  ;;  %v1752_v26 = vld [vmem:[%s1960_s18] sm:$0xff]   ;;  %v1756_v28 = vld [vmem:[%s1972_s27 + $0x28] sm:$0xff]   ;;  %v1759_v31 = vld [vmem:[%s1972_s27 + $0x18] sm:$0xff]  }
  0x3f   : > { %v1760_v32 = vld [vmem:[%s1972_s27 + $0x38] sm:$0xff]   ;;  %v476_v34 = vld [vmem:[#allocation2 + $0x10] sm:$0xff]  ;;  %v474_v38 = vld [vmem:[#allocation2 + $0x40] sm:$0xff] }
  0x40   : > { %1579 = vmatpush3.bf16.msra.mxu0 %v1746_v18  ;;  %1681 = vmatpush3.bf16.msra.mxu1 %v1746_v18  ;;  %v468_v33 = vld [vmem:[#allocation2 + $0x58] sm:$0xff]  ;;  %v466_v37 = vld [vmem:[#allocation2 + $0x30] sm:$0xff]  ;;  %v467_v49 = vld [vmem:[#allocation2] sm:$0xff] }
  0x41   : > { %1580 = vmatprep.subr.bf16.mxu0 %v1747_v19  ;;  %1674 = vmatprep.subr.bf16.mxu1 %v1747_v19  ;;  %v469_v43 = vld [vmem:[#allocation2 + $0x18] sm:$0xff]  ;;  %v475_v50 = vld [vmem:[#allocation2 + $0x20] sm:$0xff]  ;;  %v472_v55 = vld [vmem:[#allocation2 + $0x8] sm:$0xff] }
  0x42   : > { %v477_v44 = vld [vmem:[#allocation2 + $0x38] sm:$0xff]  ;;  %v470_v61 = vld [vmem:[#allocation2 + $0x50] sm:$0xff]  ;;  %v478_v62 = vld [vmem:[#allocation2 + $0x60] sm:$0xff] }
  0x43   : > { %v480_v56 = vld [vmem:[#allocation2 + $0x78] sm:$0xff]  ;;  %v473_v3 = vld [vmem:[#allocation2 + $0x48] sm:$0xff]  ;;  %v479_v10 = vld [vmem:[#allocation2 + $0x70] sm:$0xff] }
  0x44   : > { %1581 = vmatpush3.bf16.msra.mxu0 %v1747_v19  ;;  %1682 = vmatpush3.bf16.msra.mxu1 %v1747_v19  ;;  %v481_v4 = vld [vmem:[#allocation2 + $0x28] sm:$0xff] }
  0x45   : > { %1582 = vmatprep.subr.bf16.mxu0 %v1748_v20  ;;  %1675 = vmatprep.subr.bf16.mxu1 %v1748_v20  ;;  %v471_v9 = vld [vmem:[#allocation2 + $0x68] sm:$0xff] }
  0x48   : > { %1583 = vmatpush3.bf16.msra.mxu0 %v1748_v20  ;;  %1683 = vmatpush3.bf16.msra.mxu1 %v1748_v20 }
  0x49   : > { %1584 = vmatprep.subr.bf16.mxu0 %v1749_v23  ;;  %1676 = vmatprep.subr.bf16.mxu1 %v1749_v23 }
  0x4c   : > { %1585 = vmatpush3.bf16.msra.mxu0 %v1749_v23  ;;  %1684 = vmatpush3.bf16.msra.mxu1 %v1749_v23 }
  0x4d   : > { %1586 = vmatprep.subr.bf16.mxu0 %v1750_v24  ;;  %1677 = vmatprep.subr.bf16.mxu1 %v1750_v24 }
  0x50   : > { %1587 = vmatpush3.bf16.msra.mxu0 %v1750_v24  ;;  %1685 = vmatpush3.bf16.msra.mxu1 %v1750_v24 }
  0x51   : > { %1588 = vmatprep.subr.bf16.mxu0 %v1751_v25  ;;  %1678 = vmatprep.subr.bf16.mxu1 %v1751_v25 }
  0x54   : > { %1589 = vmatpush3.bf16.msra.mxu0 %v1751_v25  ;;  %1686 = vmatpush3.bf16.msra.mxu1 %v1751_v25 }
  0x55   : > { %1590 = vmatprep.subr.bf16.mxu0 %v1752_v26  ;;  %1679 = vmatprep.subr.bf16.mxu1 %v1752_v26 }
  0x58   : > { %1591 = vmatpush3.bf16.msra.mxu0 %v1752_v26  ;;  %1687 = vmatpush3.bf16.msra.mxu1 %v1752_v26 }
  0x5b   : > { %1593 = vmatmul.mubr.bf16.vlgmr.msra.gmra.mxu0 %v1755_v27  ;;  %1601 = vmatmul.mubr.bf16.vlgmr.msra.gmra.mxu1 %v1756_v28 }
  0x5c   : > { %1596 = vmatprep.mubr.bf16.mxu0 %v1757_v29  ;;  %1604 = vmatprep.mubr.bf16.mxu1 %v1758_v30 }
  0x63   : > { %1597 = vmatmul.mubr.bf16.gmra.mxu0 %v1759_v31  ;;  %1605 = vmatmul.mubr.bf16.gmra.mxu1 %v1760_v32 }
 0x11b   : > { %v1594_v35 = vpop.f32.mrf.mxu0  ;;  %v1602_v36 = vpop.f32.mrf.mxu1 }
 0x11c   : > { %v709_v39 = vadd.f32 %v1594_v35, %v468_v33  ;;  %v717_v40 = vadd.f32 %v1602_v36, %v476_v34 }
 0x11d   : > { %v644_v41 = vpop.f32.mrf.mxu0  ;;  %v676_v42 = vpop.f32.mrf.mxu1 }
 0x11e   : > { %725 = vst [vmem:[#allocation2 + $0x58] sm:$0xff] %v709_v39  ;;  %733 = vst [vmem:[#allocation2 + $0x10] sm:$0xff] %v717_v40  ;;  %v707_v45 = vadd.f32 %v644_v41, %v466_v37  ;;  %v715_v46 = vadd.f32 %v676_v42, %v474_v38 }
 0x11f   : > { %v1595_v47 = vpop.f32.mrf.mxu0  ;;  %v1603_v48 = vpop.f32.mrf.mxu1 }
 0x120   : > { %723 = vst [vmem:[#allocation2 + $0x30] sm:$0xff] %v707_v45  ;;  %731 = vst [vmem:[#allocation2 + $0x40] sm:$0xff] %v715_v46  ;;  %v710_v51 = vadd.f32 %v1595_v47, %v469_v43  ;;  %v718_v52 = vadd.f32 %v1603_v48, %v477_v44 }
 0x121   : > { %v647_v53 = vpop.f32.mrf.mxu0  ;;  %v679_v54 = vpop.f32.mrf.mxu1 }
 0x122   : > { %726 = vst [vmem:[#allocation2 + $0x18] sm:$0xff] %v710_v51  ;;  %734 = vst [vmem:[#allocation2 + $0x38] sm:$0xff] %v718_v52  ;;  %v708_v57 = vadd.f32 %v647_v53, %v467_v49  ;;  %v716_v58 = vadd.f32 %v679_v54, %v475_v50 }
 0x123   : > { %v1598_v59 = vpop.f32.mrf.mxu0  ;;  %v1606_v60 = vpop.f32.mrf.mxu1 }
 0x124   : > { %724 = vst [vmem:[#allocation2] sm:$0xff] %v708_v57  ;;  %732 = vst [vmem:[#allocation2 + $0x20] sm:$0xff] %v716_v58  ;;  %v713_v63 = vadd.f32 %v1598_v59, %v472_v55  ;;  %v721_v0 = vadd.f32 %v1606_v60, %v480_v56 }
 0x125   : > { %v660_v1 = vpop.f32.mrf.mxu0  ;;  %v692_v2 = vpop.f32.mrf.mxu1 }
 0x126   : > { %729 = vst [vmem:[#allocation2 + $0x8] sm:$0xff] %v713_v63  ;;  %737 = vst [vmem:[#allocation2 + $0x78] sm:$0xff] %v721_v0  ;;  %v711_v5 = vadd.f32 %v660_v1, %v470_v61  ;;  %v719_v6 = vadd.f32 %v692_v2, %v478_v62 }
 0x127   : > { %v1599_v7 = vpop.f32.mrf.mxu0  ;;  %v1607_v8 = vpop.f32.mrf.mxu1 }
 0x128   : > { %727 = vst [vmem:[#allocation2 + $0x50] sm:$0xff] %v711_v5  ;;  %735 = vst [vmem:[#allocation2 + $0x60] sm:$0xff] %v719_v6  ;;  %v714_v11 = vadd.f32 %v1599_v7, %v473_v3  ;;  %v722_v12 = vadd.f32 %v1607_v8, %v481_v4  ;;  %742 = sbr.rel (%p1388_p13) target bundleno = 768 (0x300), region = 97 }
 0x129   : > { %v663_v13 = vpop.f32.mrf.mxu0  ;;  %v695_v14 = vpop.f32.mrf.mxu1 }
 0x12a   : > { %730 = vst [vmem:[#allocation2 + $0x48] sm:$0xff] %v714_v11  ;;  %738 = vst [vmem:[#allocation2 + $0x28] sm:$0xff] %v722_v12  ;;  %v712_v15 = vadd.f32 %v663_v13, %v471_v9  ;;  %v720_v16 = vadd.f32 %v695_v14, %v479_v10 }
 0x12c   : > { %728 = vst [vmem:[#allocation2 + $0x68] sm:$0xff] %v712_v15  ;;  %736 = vst [vmem:[#allocation2 + $0x70] sm:$0xff] %v720_v16 }
 0x12d   : > { %v1761_v17 = vld [vmem:[%s2086_s3 + $0x38] sm:$0xff]   ;;  %v1762_v18 = vld [vmem:[%s2086_s3 + $0x30] sm:$0xff]   ;;  %v1763_v19 = vld [vmem:[%s2086_s3 + $0x28] sm:$0xff]  }
 0x12e   : > { %1608 = vmatprep.subr.bf16.mxu0 %v1761_v17  ;;  %v1764_v20 = vld [vmem:[%s2086_s3 + $0x20] sm:$0xff]   ;;  %v743_v21 = vld [vmem:[#allocation2 + $0x30] sm:$0xff]  ;;  %v1765_v28 = vld [vmem:[%s2086_s3 + $0x18] sm:$0xff]  }
 0x12f   : > { %1609 = vmatpush3.bf16.msra.mxu0 %v1761_v17  ;;  %v744_v22 = vld [vmem:[#allocation2] sm:$0xff]  ;;  %v1766_v30 = vld [vmem:[%s2086_s3 + $0x10] sm:$0xff]   ;;  %v1769_v31 = vld [vmem:[%s2088_s5 + $0x38] sm:$0xff]  }
 0x130   : > { %1610 = vmatprep.subr.bf16.mxu0 %v1762_v18  ;;  %v1443_v23 = vld [vmem:[%s1965_s22] sm:$0xff]   ;;  %v1770_v32 = vld [vmem:[%s2088_s5 + $0x30] sm:$0xff]   ;;  %v1767_v33 = vld [vmem:[%s2086_s3 + $0x8] sm:$0xff]   ;;  %1640 = vmatprep.subr.bf16.mxu1 %v1769_v31 }
 0x131   : > { %v1444_v24 = vunpack.c.l.bf16 %v1443_v23  ;;  %v1445_v25 = vunpack.c.h.bf16 %v1443_v23  ;;  %v1514_v34 = vld [vmem:[%s1965_s22 + $0x8] sm:$0xff]   ;;  %v1515_v35 = vld [vmem:[%s1965_s22 + $0x10] sm:$0xff]   ;;  %1641 = vmatpush3.bf16.msra.mxu1 %v1769_v31  ;;  %v1768_v39 = vld [vmem:[%s2086_s3] sm:$0xff]  }
 0x132   : > { %1642 = vmatprep.subr.bf16.mxu1 %v1770_v32  ;;  %v1771_v36 = vld [vmem:[%s2088_s5 + $0x28] sm:$0xff]   ;;  %v1448_v37 = vunpack.c.l.bf16 %v1514_v34  ;;  %v1449_v38 = vunpack.c.h.bf16 %v1514_v34  ;;  %v745_v40 = vld [vmem:[#allocation2 + $0x58] sm:$0xff]  ;;  %v1452_v42 = vunpack.c.l.bf16 %v1515_v35  ;;  %v1453_v43 = vunpack.c.h.bf16 %v1515_v35  ;;  %v747_v44 = vld [vmem:[#allocation2 + $0x50] sm:$0xff] }
 0x133   : > { %1611 = vmatpush3.bf16.msra.mxu0 %v1762_v18  ;;  %v791_v26 = vadd.f32 %v1444_v24, %v743_v21  ;;  %v792_v27 = vadd.f32 %v1445_v25, %v744_v22  ;;  %v746_v41 = vld [vmem:[#allocation2 + $0x18] sm:$0xff]  ;;  %v748_v45 = vld [vmem:[#allocation2 + $0x68] sm:$0xff]  ;;  %v1772_v46 = vld [vmem:[%s2088_s5 + $0x20] sm:$0xff]  }
 0x134   : > { %1612 = vmatprep.subr.bf16.mxu0 %v1763_v19  ;;  %v793_v47 = vadd.f32 %v1448_v37, %v745_v40  ;;  %v794_v48 = vadd.f32 %v1449_v38, %v746_v41  ;;  %v795_v49 = vadd.f32 %v1452_v42, %v747_v44  ;;  %v796_v50 = vadd.f32 %v1453_v43, %v748_v45  ;;  %v1516_v51 = vld [vmem:[%s1965_s22 + $0x18] sm:$0xff]   ;;  %v1517_v52 = vld [vmem:[%s1965_s22 + $0x20] sm:$0xff]   ;;  %v749_v58 = vld [vmem:[#allocation2 + $0x8] sm:$0xff] }
 0x135   : > { %v807_v29 = vpack.c.bf16 %v792_v27, %v791_v26  ;;  %1643 = vmatpush3.bf16.msra.mxu1 %v1770_v32  ;;  %v1773_v53 = vld [vmem:[%s2088_s5 + $0x18] sm:$0xff]   ;;  %v1456_v55 = vunpack.c.l.bf16 %v1516_v51  ;;  %v1457_v56 = vunpack.c.h.bf16 %v1516_v51  ;;  %v750_v59 = vld [vmem:[#allocation2 + $0x48] sm:$0xff]  ;;  %v1460_v60 = vunpack.c.l.bf16 %v1517_v52  ;;  %v751_v62 = vld [vmem:[#allocation2 + $0x40] sm:$0xff] }
 0x136   : > { %1644 = vmatprep.subr.bf16.mxu1 %v1771_v36  ;;  %v808_v54 = vpack.c.bf16 %v794_v48, %v793_v47  ;;  %v809_v57 = vpack.c.bf16 %v796_v50, %v795_v49  ;;  %v1461_v61 = vunpack.c.h.bf16 %v1517_v52  ;;  %v752_v63 = vld [vmem:[#allocation2 + $0x20] sm:$0xff]  ;;  %v1518_v4 = vld [vmem:[%s1965_s22 + $0x28] sm:$0xff]   ;;  %v1519_v5 = vld [vmem:[%s1965_s22 + $0x30] sm:$0xff]  }
 0x137   : > { %1613 = vmatpush3.bf16.msra.mxu0 %v1763_v19  ;;  %1624 = vmatprep.mubr.bf16.mxu0 %v807_v29  ;;  %v797_v0 = vadd.f32 %v1456_v55, %v749_v58  ;;  %v798_v1 = vadd.f32 %v1457_v56, %v750_v59  ;;  %v799_v2 = vadd.f32 %v1460_v60, %v751_v62  ;;  %v1464_v7 = vunpack.c.l.bf16 %v1518_v4  ;;  %v753_v10 = vld [vmem:[#allocation2 + $0x10] sm:$0xff]  ;;  %v754_v11 = vld [vmem:[#allocation2 + $0x38] sm:$0xff]  ;;  %v755_v14 = vld [vmem:[#allocation2 + $0x60] sm:$0xff] }
 0x138   : > { %1614 = vmatprep.subr.bf16.mxu0 %v1764_v20  ;;  %v800_v3 = vadd.f32 %v1461_v61, %v752_v63  ;;  %v1465_v8 = vunpack.c.h.bf16 %v1518_v4  ;;  %v1468_v12 = vunpack.c.l.bf16 %v1519_v5  ;;  %v1469_v13 = vunpack.c.h.bf16 %v1519_v5  ;;  %v756_v15 = vld [vmem:[#allocation2 + $0x70] sm:$0xff]  ;;  %v757_v25 = vld [vmem:[#allocation2 + $0x78] sm:$0xff]  ;;  %v758_v26 = vld [vmem:[#allocation2 + $0x28] sm:$0xff] }
 0x139   : > { %1645 = vmatpush3.bf16.msra.mxu1 %v1771_v36  ;;  %v810_v6 = vpack.c.bf16 %v798_v1, %v797_v0  ;;  %v801_v16 = vadd.f32 %v1464_v7, %v753_v10  ;;  %v1775_v31 = vld [vmem:[%s2088_s5 + $0x8] sm:$0xff]   ;;  %v1776_v32 = vld [vmem:[%s2088_s5] sm:$0xff]  }
 0x13a   : > { %1646 = vmatprep.subr.bf16.mxu1 %v1772_v46  ;;  %v811_v9 = vpack.c.bf16 %v800_v3, %v799_v2  ;;  %v802_v17 = vadd.f32 %v1465_v8, %v754_v11  ;;  %v803_v18 = vadd.f32 %v1468_v12, %v755_v14  ;;  %v804_v19 = vadd.f32 %v1469_v13, %v756_v15  ;;  %v1389_v35 = vld [vmem:[%s2087_s4] ss:$0 sm:$0xff] }
 0x13b   : > { %1615 = vmatpush3.bf16.msra.mxu0 %v1764_v20  ;;  %v1520_v20 = vld [vmem:[%s1965_s22 + $0x38] sm:$0xff]  }
 0x13c   : > { %1616 = vmatprep.subr.bf16.mxu0 %v1765_v28  ;;  %v812_v21 = vpack.c.bf16 %v802_v17, %v801_v16  ;;  %v1472_v22 = vunpack.c.l.bf16 %v1520_v20  ;;  %v1473_v23 = vunpack.c.h.bf16 %v1520_v20  ;;  %v813_v24 = vpack.c.bf16 %v804_v19, %v803_v18 }
 0x13d   : > { %1647 = vmatpush3.bf16.msra.mxu1 %v1772_v46 }
 0x13e   : > { %1648 = vmatprep.subr.bf16.mxu1 %v1773_v53  ;;  %v805_v27 = vadd.f32 %v1472_v22, %v757_v25 }
 0x13f   : > { %1617 = vmatpush3.bf16.msra.mxu0 %v1765_v28  ;;  %v806_v28 = vadd.f32 %v1473_v23, %v758_v26 }
 0x140   : > { %1618 = vmatprep.subr.bf16.mxu0 %v1766_v30 }
 0x141   : > { %1649 = vmatpush3.bf16.msra.mxu1 %v1773_v53  ;;  %v814_v29 = vpack.c.bf16 %v806_v28, %v805_v27  ;;  %v1398_v27 = vld [vmem:[%s2089_s6] ss:$0 sm:$0xff] }
 0x143   : > { %1619 = vmatpush3.bf16.msra.mxu0 %v1766_v30  ;;  %v1774_v30 = vld [vmem:[%s2088_s5 + $0x10] sm:$0xff]  }
 0x144   : > { %1620 = vmatprep.subr.bf16.mxu0 %v1767_v33  ;;  %1650 = vmatprep.subr.bf16.mxu1 %v1774_v30 }
 0x145   : > { %1651 = vmatpush3.bf16.msra.mxu1 %v1774_v30 }
 0x146   : > { %1652 = vmatprep.subr.bf16.mxu1 %v1775_v31 }
 0x147   : > { %1621 = vmatpush3.bf16.msra.mxu0 %v1767_v33 }
 0x148   : > { %1622 = vmatprep.subr.bf16.mxu0 %v1768_v39 }
 0x149   : > { %1653 = vmatpush3.bf16.msra.mxu1 %v1775_v31 }
 0x14a   : > { %1654 = vmatprep.subr.bf16.mxu1 %v1776_v32 }
 0x14b   : > { %1623 = vmatpush3.bf16.msra.mxu0 %v1768_v39 }
 0x14d   : > { %1655 = vmatpush3.bf16.msra.mxu1 %v1776_v32 }
 0x14e   : > { %1625 = vmatmul.mubr.bf16.vlgmr.msra.gmra.mxu0 %v808_v54 }
 0x14f   : > { %1628 = vmatprep.mubr.bf16.mxu0 %v809_v57 }
 0x156   : > { %1629 = vmatmul.mubr.bf16.gmra.mxu0 %v810_v6 }
 0x157   : > { %1632 = vmatprep.mubr.bf16.mxu0 %v811_v9 }
 0x15e   : > { %1633 = vmatmul.mubr.bf16.gmra.mxu0 %v812_v21 }
 0x15f   : > { %1636 = vmatprep.mubr.bf16.mxu0 %v813_v24 }
 0x166   : > { %1637 = vmatmul.mubr.bf16.gmra.mxu0 %v814_v29 }
 0x20e   : > { %v1626_v33 = vpop.f32.mrf.mxu0 }
 0x20f   : > { %v929_v39 = vadd.f32 %v1626_v33, %v1389_v35 }
 0x210   : > { %v920_v34 = vpop.f32.mrf.mxu0 }
 0x211   : > { %v921_v37 = vadd.f32 %v1389_v35, %v920_v34  ;;  %v985_v46 = vmax.f32 %v929_v39, 0.0 }
 0x212   : > { %v1627_v36 = vpop.f32.mrf.mxu0 }
 0x213   : > { %v932_v38 = vadd.f32 %v1627_v36, %v1389_v35  ;;  %v983_v44 = vmax.f32 %v921_v37, 0.0 }
 0x214   : > { %v923_v40 = vpop.f32.mrf.mxu0 }
 0x215   : > { %v924_v41 = vadd.f32 %v1389_v35, %v923_v40  ;;  %v986_v42 = vmax.f32 %v932_v38, 0.0 }
 0x216   : > { %v1630_v43 = vpop.f32.mrf.mxu0 }
 0x217   : > { %v984_v45 = vmax.f32 %v924_v41, 0.0  ;;  %v1000_v49 = vpack.c.bf16 %v986_v42, %v985_v46  ;;  %v945_v53 = vadd.f32 %v1630_v43, %v1389_v35 }
 0x218   : > { %v936_v47 = vpop.f32.mrf.mxu0 }
 0x219   : > { %v999_v48 = vpack.c.bf16 %v984_v45, %v983_v44  ;;  %v937_v51 = vadd.f32 %v1389_v35, %v936_v47  ;;  %v989_v60 = vmax.f32 %v945_v53, 0.0 }
 0x21a   : > { %v1631_v50 = vpop.f32.mrf.mxu0 }
 0x21b   : > { %v948_v52 = vadd.f32 %v1631_v50, %v1389_v35  ;;  %1656 = vmatprep.mubr.bf16.mxu1 %v999_v48  ;;  %v987_v58 = vmax.f32 %v937_v51, 0.0 }
 0x21c   : > { %v939_v54 = vpop.f32.mrf.mxu0  ;;  %1657 = vmatmul.mubr.bf16.vlgmr.msra.gmra.mxu1 %v1000_v49 }
 0x21d   : > { %v940_v55 = vadd.f32 %v1389_v35, %v939_v54  ;;  %v990_v56 = vmax.f32 %v948_v52, 0.0 }
 0x21e   : > { %v1634_v57 = vpop.f32.mrf.mxu0 }
 0x21f   : > { %v988_v59 = vmax.f32 %v940_v55, 0.0  ;;  %v1002_v63 = vpack.c.bf16 %v990_v56, %v989_v60  ;;  %v961_v3 = vadd.f32 %v1634_v57, %v1389_v35 }
 0x220   : > { %v952_v61 = vpop.f32.mrf.mxu0 }
 0x221   : > { %v1001_v62 = vpack.c.bf16 %v988_v59, %v987_v58  ;;  %v953_v1 = vadd.f32 %v1389_v35, %v952_v61  ;;  %v993_v10 = vmax.f32 %v961_v3, 0.0 }
 0x222   : > { %v1635_v0 = vpop.f32.mrf.mxu0 }
 0x223   : > { %v964_v2 = vadd.f32 %v1635_v0, %v1389_v35  ;;  %1660 = vmatprep.mubr.bf16.mxu1 %v1001_v62  ;;  %v991_v8 = vmax.f32 %v953_v1, 0.0 }
 0x224   : > { %v955_v4 = vpop.f32.mrf.mxu0  ;;  %1661 = vmatmul.mubr.bf16.gmra.mxu1 %v1002_v63 }
 0x225   : > { %v956_v5 = vadd.f32 %v1389_v35, %v955_v4  ;;  %v994_v6 = vmax.f32 %v964_v2, 0.0 }
 0x226   : > { %v1638_v7 = vpop.f32.mrf.mxu0 }
 0x227   : > { %v992_v9 = vmax.f32 %v956_v5, 0.0  ;;  %v1004_v13 = vpack.c.bf16 %v994_v6, %v993_v10  ;;  %v977_v17 = vadd.f32 %v1638_v7, %v1389_v35 }
 0x228   : > { %v968_v11 = vpop.f32.mrf.mxu0 }
 0x229   : > { %v1003_v12 = vpack.c.bf16 %v992_v9, %v991_v8  ;;  %v969_v15 = vadd.f32 %v1389_v35, %v968_v11  ;;  %v997_v23 = vmax.f32 %v977_v17, 0.0 }
 0x22a   : > { %v1639_v14 = vpop.f32.mrf.mxu0 }
 0x22b   : > { %v980_v16 = vadd.f32 %v1639_v14, %v1389_v35  ;;  %1664 = vmatprep.mubr.bf16.mxu1 %v1003_v12  ;;  %v995_v21 = vmax.f32 %v969_v15, 0.0 }
 0x22c   : > { %v971_v18 = vpop.f32.mrf.mxu0  ;;  %1665 = vmatmul.mubr.bf16.gmra.mxu1 %v1004_v13 }
 0x22d   : > { %v972_v19 = vadd.f32 %v1389_v35, %v971_v18  ;;  %v998_v20 = vmax.f32 %v980_v16, 0.0 }
 0x22f   : > { %v996_v22 = vmax.f32 %v972_v19, 0.0  ;;  %v1006_v25 = vpack.c.bf16 %v998_v20, %v997_v23 }
 0x231   : > { %v1005_v24 = vpack.c.bf16 %v996_v22, %v995_v21 }
 0x233   : > { %1668 = vmatprep.mubr.bf16.mxu1 %v1005_v24 }
 0x234   : > { %1669 = vmatmul.mubr.bf16.gmra.mxu1 %v1006_v25 }
 0x2dc   : > { %v1658_v26 = vpop.f32.mrf.mxu1 }
 0x2dd   : > { %v1121_v30 = vadd.f32 %v1658_v26, %v1398_v27 }
 0x2de   : > { %v1112_v28 = vpop.f32.mrf.mxu1 }
 0x2df   : > { %v1113_v33 = vadd.f32 %v1398_v27, %v1112_v28 }
 0x2e0   : > { %v1659_v29 = vpop.f32.mrf.mxu1 }
 0x2e1   : > { %v1124_v31 = vadd.f32 %v1659_v29, %v1398_v27 }
 0x2e2   : > { %v1115_v32 = vpop.f32.mrf.mxu1 }
 0x2e3   : > { %v1482_v34 = vpack.c.bf16 %v1124_v31, %v1121_v30  ;;  %v1116_v35 = vadd.f32 %v1398_v27, %v1115_v32 }
 0x2e4   : > { %v1662_v36 = vpop.f32.mrf.mxu1 }
 0x2e5   : > { %1521 = vst [vmem:[%s1970_s10 + $0x8] sm:$0xff] %v1482_v34   ;;  %v1477_v37 = vpack.c.bf16 %v1116_v35, %v1113_v33  ;;  %v1137_v40 = vadd.f32 %v1662_v36, %v1398_v27 }
 0x2e6   : > { %v1128_v38 = vpop.f32.mrf.mxu1 }
 0x2e7   : > { %1478 = vst [vmem:[%s1970_s10] sm:$0xff] %v1477_v37   ;;  %v1129_v43 = vadd.f32 %v1398_v27, %v1128_v38 }
 0x2e8   : > { %v1663_v39 = vpop.f32.mrf.mxu1 }
 0x2e9   : > { %v1140_v41 = vadd.f32 %v1663_v39, %v1398_v27 }
 0x2ea   : > { %v1131_v42 = vpop.f32.mrf.mxu1 }
 0x2eb   : > { %v1492_v44 = vpack.c.bf16 %v1140_v41, %v1137_v40  ;;  %v1132_v45 = vadd.f32 %v1398_v27, %v1131_v42 }
 0x2ec   : > { %v1666_v46 = vpop.f32.mrf.mxu1 }
 0x2ed   : > { %1523 = vst [vmem:[%s1970_s10 + $0x18] sm:$0xff] %v1492_v44   ;;  %v1487_v47 = vpack.c.bf16 %v1132_v45, %v1129_v43  ;;  %v1153_v50 = vadd.f32 %v1666_v46, %v1398_v27 }
 0x2ee   : > { %v1144_v48 = vpop.f32.mrf.mxu1 }
 0x2ef   : > { %1522 = vst [vmem:[%s1970_s10 + $0x10] sm:$0xff] %v1487_v47   ;;  %v1145_v53 = vadd.f32 %v1398_v27, %v1144_v48 }
 0x2f0   : > { %v1667_v49 = vpop.f32.mrf.mxu1 }
 0x2f1   : > { %v1156_v51 = vadd.f32 %v1667_v49, %v1398_v27 }
 0x2f2   : > { %v1147_v52 = vpop.f32.mrf.mxu1 }
 0x2f3   : > { %v1502_v54 = vpack.c.bf16 %v1156_v51, %v1153_v50  ;;  %v1148_v55 = vadd.f32 %v1398_v27, %v1147_v52 }
 0x2f4   : > { %v1670_v56 = vpop.f32.mrf.mxu1 }
 0x2f5   : > { %1525 = vst [vmem:[%s1970_s10 + $0x28] sm:$0xff] %v1502_v54   ;;  %v1497_v57 = vpack.c.bf16 %v1148_v55, %v1145_v53  ;;  %v1169_v60 = vadd.f32 %v1670_v56, %v1398_v27 }
 0x2f6   : > { %v1160_v58 = vpop.f32.mrf.mxu1 }
 0x2f7   : > { %1524 = vst [vmem:[%s1970_s10 + $0x20] sm:$0xff] %v1497_v57   ;;  %v1161_v63 = vadd.f32 %v1398_v27, %v1160_v58 }
 0x2f8   : > { %v1671_v59 = vpop.f32.mrf.mxu1 }
 0x2f9   : > { %v1172_v61 = vadd.f32 %v1671_v59, %v1398_v27 }
 0x2fa   : > { %v1163_v62 = vpop.f32.mrf.mxu1 }
 0x2fb   : > { %v1512_v0 = vpack.c.bf16 %v1172_v61, %v1169_v60  ;;  %v1164_v1 = vadd.f32 %v1398_v27, %v1163_v62 }
 0x2fd   : > { %1527 = vst [vmem:[%s1970_s10 + $0x38] sm:$0xff] %v1512_v0   ;;  %v1507_v2 = vpack.c.bf16 %v1164_v1, %v1161_v63 }
 0x2ff   : > { %1526 = vst [vmem:[%s1970_s10 + $0x30] sm:$0xff] %v1507_v2  }
 0x300 PF: > { %s17_s30 = sadd.s32 1, %s1831_s30   ;;  %s2091_s24 = smov %s1811_s25 }
 0x301   : > { %p14_p0 = scmp.ge.s32.totalorder %s17_s30, 6   ;;  %s2092_s25 = smov %s1925_s14 }
 0x302   : > { %s2093_s26 = smov %s1823_s28  ;;  %s2094_s27 = smov %s1827_s29 }
 0x303   : > { %s2095_s28 = smov %s2098_s8  ;;  %s2096_s29 = smov %s2102_s9 }
 0x304   :  { %16 = sbr.rel (!%p14_p0) target bundleno = 4 (0x4), region = 138 }

</bundles_post_ra>
